<compile_context>
chip_gen: v5e
topology: v5e:2x2
jax: 0.10.0
libtpu: 0.0.40
codegen_flags: <defaults>
</compile_context>

<pallas_src>
import functools

import jax
import jax.numpy as jnp
from jax import lax
from jax.experimental import pallas as pl
from jax.experimental.pallas import tpu as pltpu


def _roi_block_kernel(x_ref, masks_ref, w1_ref, b1_ref, g1_ref, be1_ref,
                      w2_ref, b2_ref, g2_ref, be2_ref, gmat_ref, out_ref,
                      p1_ref, p2_ref, *, H, W, B, G, gn_eps):
    """Fused (WSConv3x3 + GroupNorm + SiLU) x 2 for B images per grid step.

    x_ref    : (B, Cin, HW)    flattened-NCHW input tile (HW on lanes)
    masks_ref: (9, Cmax, HW)   per-tap zero-padding validity masks, pre-broadcast
                               over sublanes (plain aligned load in the kernel)
    w*_ref   : (Cout, 9*C)     pre-standardized conv weight, cols (ky,kx,ci)
    b/g/be   : (Cout, 1)       conv bias / GN gamma / GN beta
    gmat_ref : (Cout, Cout)    0/1 group-membership matrix (group-sum combine)
    out_ref  : (B, Cout, HW)   flattened-NCHW output tile
    p1_ref   : (9*Cin,  B*HW)  f32 VMEM im2col scratch for block 1
    p2_ref   : (9*Cout, B*HW)  f32 VMEM im2col scratch for block 2
    """
    HW = H * W
    gmat = gmat_ref[...]

    def write_taps(p_ref, b, img):
        # Stream the 9 im2col taps of image `b` straight into VMEM scratch.
        # Each tap's live range ends at its store (no 9-tap concat in vregs).
        C = img.shape[0]
        lo = b * HW
        k = 0
        for dy in (-1, 0, 1):
            for dx in (-1, 0, 1):
                d = dy * W + dx
                if d == 0:
                    t = img                                   # center tap: mask == 1
                else:
                    # result[p] = img[p + d] (circular); image-boundary (and,
                    # for folded batches, cross-image) taps are zeroed by mask.
                    t = (pltpu.roll(img, shift=(-d) % HW, axis=1)
                         * masks_ref[k, 0:C, :])
                # k*C and HW are multiples of 8 / 128 -> aligned stores.
                p_ref[k * C:(k + 1) * C, lo:lo + HW] = t
                k += 1

    def conv_gn_silu(p_ref, w_ref, b_r, gamma_r, beta_r):
        # Conv = one im2col MXU matmul, operand streamed from VMEM scratch.
        y = jnp.dot(w_ref[...], p_ref[...],
                    preferred_element_type=jnp.float32) + b_r       # (Cout, B*HW)
        Cout = y.shape[0]
        cnt = float((Cout // G) * HW)
        outs = []
        for b in range(B):
            ys = y[:, b * HW:(b + 1) * HW]                           # (Cout, HW)
            # One-pass GroupNorm stats: lane reductions to (Cout,1), then the
            # within-group combine is a tiny matmul with the 0/1 group matrix
            # (no (G, Cpg, HW) sublane-padded reshape).
            s1 = jnp.sum(ys, axis=1, keepdims=True)                  # (Cout, 1)
            s2 = jnp.sum(ys * ys, axis=1, keepdims=True)             # (Cout, 1)
            gs1 = jnp.dot(gmat, s1, preferred_element_type=jnp.float32)
            gs2 = jnp.dot(gmat, s2, preferred_element_type=jnp.float32)
            mean = gs1 / cnt
            var = gs2 / cnt - mean * mean                            # E[x^2]-E[x]^2
            # Fold the GN affine: yn = y*scale + shift (2 VPU ops / element).
            scale = gamma_r * lax.rsqrt(var + gn_eps)
            shift = beta_r - mean * scale
            yn = ys * scale + shift
            outs.append(yn * jax.nn.sigmoid(yn))                     # SiLU
        return outs                                                  # B x (Cout, HW)

    # block 1  (scale_shift is always None in ROIBlock.forward)
    for b in range(B):
        write_taps(p1_ref, b, x_ref[b].astype(jnp.float32))
    h = conv_gn_silu(p1_ref, w1_ref, b1_ref[...], g1_ref[...], be1_ref[...])

    # block 2 — h never leaves VMEM
    for b in range(B):
        write_taps(p2_ref, b, h[b])
    o = conv_gn_silu(p2_ref, w2_ref, b2_ref[...], g2_ref[...], be2_ref[...])

    for b in range(B):
        out_ref[b] = o[b].astype(out_ref.dtype)


def _standardize_weight(w_oihw, eps, cin_pad):
    """Weight standardization (done once in the wrapper), reshaped for the kernel.

    (Cout, Cin, 3, 3) -> (Cout, 9*Cin_pad), column index = (ky*3+kx)*Cin_pad + ci,
    matching the im2col row ordering inside the kernel. Padded input channels
    get zero weight columns.
    """
    w = w_oihw.astype(jnp.float32)
    mean = jnp.mean(w, axis=(1, 2, 3), keepdims=True)
    var = jnp.mean((w - mean) ** 2, axis=(1, 2, 3), keepdims=True)   # unbiased=False
    w_std = (w - mean) * lax.rsqrt(var + eps)
    cout, cin = w_oihw.shape[0], w_oihw.shape[1]
    w_std = jnp.transpose(w_std, (0, 2, 3, 1))                        # (Cout,3,3,Cin)
    if cin_pad != cin:
        w_std = jnp.pad(w_std, ((0, 0), (0, 0), (0, 0), (0, cin_pad - cin)))
    return w_std.reshape(cout, 9 * cin_pad)


def _conv_tap_masks(H, W, cmax):
    """(9, cmax, H*W) validity masks for the 9 conv taps (zero 'same' padding),
    pre-broadcast over sublanes so the kernel only does an aligned load."""
    hh = jnp.arange(H)[:, None]
    ww = jnp.arange(W)[None, :]
    rows = []
    for dy in (-1, 0, 1):
        for dx in (-1, 0, 1):
            m = ((hh + dy >= 0) & (hh + dy < H) &
                 (ww + dx >= 0) & (ww + dx < W))
            rows.append(m.astype(jnp.float32).reshape(H * W))
    masks = jnp.stack(rows, axis=0)                                   # (9, HW)
    return jnp.broadcast_to(masks[:, None, :], (9, cmax, H * W))


def roi_block(x_nchw, params, *, groups, ws_eps=1e-5, gn_eps=1e-5,
              num_grid_steps=None):
    """ROIBlock.forward: h = block2(block1(x)); scale_shift is None. NCHW in/out."""
    N, Cin, H, W = x_nchw.shape
    Cout = params["w1"].shape[0]
    assert params["w2"].shape == (Cout, Cout, 3, 3)
    assert Cout % groups == 0
    HW = H * W
    assert HW % 128 == 0, "roll+mask 'same' padding requires H*W % 128 == 0"
    assert Cout % 8 == 0, "Cout must be a multiple of 8 (aligned im2col taps)"

    # Grid: default 2 parallel steps so both v7x TensorCores get work; the
    # rest of the batch is folded onto the lane axis inside each step.
    # On single-TC v5e/v6e, num_grid_steps=1 is strictly best.
    if num_grid_steps is None:
        num_grid_steps = 2 if (N >= 2 and N % 2 == 0) else 1
    assert N % num_grid_steps == 0
    B = N // num_grid_steps

    Cin_pad = -(-Cin // 8) * 8
    Cmax = max(Cin_pad, Cout)

    x_flat = x_nchw.reshape(N, Cin, HW)            # flattened NCHW (free reshape)
    if Cin_pad != Cin:
        x_flat = jnp.pad(x_flat, ((0, 0), (0, Cin_pad - Cin), (0, 0)))

    w1_r = _standardize_weight(params["w1"], ws_eps, Cin_pad)
    w2_r = _standardize_weight(params["w2"], ws_eps, Cout)
    b1_r = params["b1"].reshape(Cout, 1).astype(jnp.float32)
    g1_r = params["g1"].reshape(Cout, 1).astype(jnp.float32)
    be1_r = params["beta1"].reshape(Cout, 1).astype(jnp.float32)
    b2_r = params["b2"].reshape(Cout, 1).astype(jnp.float32)
    g2_r = params["g2"].reshape(Cout, 1).astype(jnp.float32)
    be2_r = params["beta2"].reshape(Cout, 1).astype(jnp.float32)
    masks = _conv_tap_masks(H, W, Cmax)

    cpg = Cout // groups
    gidx = jnp.arange(Cout) // cpg
    gmat = (gidx[:, None] == gidx[None, :]).astype(jnp.float32)       # (Cout, Cout)

    kernel = functools.partial(_roi_block_kernel, H=H, W=W, B=B, G=groups,
                               gn_eps=gn_eps)
    const2 = lambda n: (0, 0)
    const3 = lambda n: (0, 0, 0)

    out = pl.pallas_call(
        kernel,
        out_shape=jax.ShapeDtypeStruct((N, Cout, HW), x_nchw.dtype),
        grid_spec=pltpu.PrefetchScalarGridSpec(
            num_scalar_prefetch=0,
            grid=(num_grid_steps,),
            in_specs=[
                pl.BlockSpec((B, Cin_pad, HW), lambda n: (n, 0, 0)),
                pl.BlockSpec((9, Cmax, HW), const3),
                pl.BlockSpec((Cout, 9 * Cin_pad), const2),
                pl.BlockSpec((Cout, 1), const2),
                pl.BlockSpec((Cout, 1), const2),
                pl.BlockSpec((Cout, 1), const2),
                pl.BlockSpec((Cout, 9 * Cout), const2),
                pl.BlockSpec((Cout, 1), const2),
                pl.BlockSpec((Cout, 1), const2),
                pl.BlockSpec((Cout, 1), const2),
                pl.BlockSpec((Cout, Cout), const2),
            ],
            out_specs=pl.BlockSpec((B, Cout, HW), lambda n: (n, 0, 0)),
            scratch_shapes=[
                pltpu.VMEM((9 * Cin_pad, B * HW), jnp.float32),   # im2col, block 1
                pltpu.VMEM((9 * Cout, B * HW), jnp.float32),      # im2col, block 2
            ]),
        compiler_params=pltpu.CompilerParams(
            dimension_semantics=("parallel",),      # batch-chunk axis -> both TCs on v7x
            vmem_limit_bytes=32 * 1024 * 1024),
    )(x_flat, masks, w1_r, b1_r, g1_r, be1_r, w2_r, b2_r, g2_r, be2_r, gmat)

    return out.reshape(N, Cout, H, W)


# ----------------------- pure-JAX reference (for checking) -----------------------
def _ref_block_nchw(x, w, b, gamma, beta, groups, eps=1e-5):
    wf = w.astype(jnp.float32)
    mean = jnp.mean(wf, axis=(1, 2, 3), keepdims=True)
    var = jnp.mean((wf - mean) ** 2, axis=(1, 2, 3), keepdims=True)
    w_std = (wf - mean) * lax.rsqrt(var + eps)
    y = lax.conv_general_dilated(x, w_std, (1, 1), "SAME",
                                 dimension_numbers=("NCHW", "OIHW", "NCHW"))
    y = y + b.reshape(1, -1, 1, 1)
    N, C, H, W = y.shape
    yg = y.reshape(N, groups, C // groups, H, W)
    m = jnp.mean(yg, axis=(2, 3, 4), keepdims=True)
    v = jnp.mean((yg - m) ** 2, axis=(2, 3, 4), keepdims=True)
    yn = ((yg - m) * lax.rsqrt(v + eps)).reshape(N, C, H, W)
    yn = yn * gamma.reshape(1, -1, 1, 1) + beta.reshape(1, -1, 1, 1)
    return yn * jax.nn.sigmoid(yn)


def _ref_roi_block(x_nchw, params, groups):
    h = _ref_block_nchw(x_nchw, params["w1"], params["b1"],
                        params["g1"], params["beta1"], groups)
    h = _ref_block_nchw(h, params["w2"], params["b2"],
                        params["g2"], params["beta2"], groups)
    return h


if __name__ == "__main__":
    key = jax.random.PRNGKey(0)
    N, Cin, H, W = 2, 8, 16, 16      # dim = 8
    Cout, groups = 16, 8             # dim_out = 16, groups = 8
    ks = jax.random.split(key, 11)

    # PyTorch-convention NCHW input
    x_nchw = jax.random.normal(ks[0], (N, Cin, H, W), jnp.float32)

    # Deterministic synthetic parameters (shapes match the nn.Module __init__)
    params = {
        "w1": 0.1 * jax.random.normal(ks[1], (Cout, Cin, 3, 3), jnp.float32),
        "b1": 0.1 * jax.random.normal(ks[2], (Cout,), jnp.float32),
        "g1": 1.0 + 0.1 * jax.random.normal(ks[3], (Cout,), jnp.float32),
        "beta1": 0.1 * jax.random.normal(ks[4], (Cout,), jnp.float32),
        "w2": 0.1 * jax.random.normal(ks[5], (Cout, Cout, 3, 3), jnp.float32),
        "b2": 0.1 * jax.random.normal(ks[6], (Cout,), jnp.float32),
        "g2": 1.0 + 0.1 * jax.random.normal(ks[7], (Cout,), jnp.float32),
        "beta2": 0.1 * jax.random.normal(ks[8], (Cout,), jnp.float32),
    }

    out = roi_block(x_nchw, params, groups=groups)
    out = jax.block_until_ready(out)

    ref = _ref_roi_block(x_nchw, params, groups)
    assert out.shape == (N, Cout, H, W)
    assert jnp.allclose(out, ref, atol=1e-3, rtol=1e-3), (
        float(jnp.max(jnp.abs(out - ref))))

    print("KERNEL_OK")
</pallas_src>

<mosaic_0001>
module attributes {stable_mosaic.version = 11 : i64} {
  func.func @_roi_block_kernel(%arg0: i32, %arg1: memref<1x8x256xf32, #tpu.memory_space<vmem>>, %arg2: memref<9x16x256xf32, #tpu.memory_space<vmem>>, %arg3: memref<16x72xf32, #tpu.memory_space<vmem>>, %arg4: memref<16x1xf32, #tpu.memory_space<vmem>>, %arg5: memref<16x1xf32, #tpu.memory_space<vmem>>, %arg6: memref<16x1xf32, #tpu.memory_space<vmem>>, %arg7: memref<16x144xf32, #tpu.memory_space<vmem>>, %arg8: memref<16x1xf32, #tpu.memory_space<vmem>>, %arg9: memref<16x1xf32, #tpu.memory_space<vmem>>, %arg10: memref<16x1xf32, #tpu.memory_space<vmem>>, %arg11: memref<16x16xf32, #tpu.memory_space<vmem>>, %arg12: memref<1x16x256xf32, #tpu.memory_space<vmem>>, %arg13: memref<72x256xf32, #tpu.memory_space<vmem>>, %arg14: memref<144x256xf32, #tpu.memory_space<vmem>>) attributes {dimension_semantics = [#tpu.dimension_semantics<parallel>], iteration_bounds = array<i64: 2>, scalar_prefetch = 0 : i64, scratch_operands = 2 : i64, tpu.core_type = #tpu.core_type<tc>, window_params = [{transform_indices = @transform_0, window_bounds = array<i64: 1, 8, 256>}, {pipeline_mode = #tpu.pipeline_mode<synchronous>, transform_indices = @transform_1, window_bounds = array<i64: 9, 16, 256>}, {pipeline_mode = #tpu.pipeline_mode<synchronous>, transform_indices = @transform_2, window_bounds = array<i64: 16, 72>}, {pipeline_mode = #tpu.pipeline_mode<synchronous>, transform_indices = @transform_3, window_bounds = array<i64: 16, 1>}, {pipeline_mode = #tpu.pipeline_mode<synchronous>, transform_indices = @transform_4, window_bounds = array<i64: 16, 1>}, {pipeline_mode = #tpu.pipeline_mode<synchronous>, transform_indices = @transform_5, window_bounds = array<i64: 16, 1>}, {pipeline_mode = #tpu.pipeline_mode<synchronous>, transform_indices = @transform_6, window_bounds = array<i64: 16, 144>}, {pipeline_mode = #tpu.pipeline_mode<synchronous>, transform_indices = @transform_7, window_bounds = array<i64: 16, 1>}, {pipeline_mode = #tpu.pipeline_mode<synchronous>, transform_indices = @transform_8, window_bounds = array<i64: 16, 1>}, {pipeline_mode = #tpu.pipeline_mode<synchronous>, transform_indices = @transform_9, window_bounds = array<i64: 16, 1>}, {pipeline_mode = #tpu.pipeline_mode<synchronous>, transform_indices = @transform_10, window_bounds = array<i64: 16, 16>}, {transform_indices = @transform_11, window_bounds = array<i64: 1, 16, 256>}]} {
    %c0 = arith.constant 0 : index
    %c0_0 = arith.constant 0 : index
    %0 = vector.load %arg11[%c0, %c0_0] : memref<16x16xf32, #tpu.memory_space<vmem>>, vector<16x16xf32>
    %c0_1 = arith.constant 0 : index
    %c0_2 = arith.constant 0 : index
    %c0_3 = arith.constant 0 : index
    %1 = vector.load %arg1[%c0_1, %c0_2, %c0_3] : memref<1x8x256xf32, #tpu.memory_space<vmem>>, vector<1x8x256xf32>
    %2 = vector.shape_cast %1 : vector<1x8x256xf32> to vector<8x256xf32>
    %c17_i32 = arith.constant 17 : i32
    %3 = tpu.dynamic_rotate %2 by %c17_i32 dim 1 : vector<8x256xf32>, i32 -> vector<8x256xf32>
    %c0_4 = arith.constant 0 : index
    %c0_5 = arith.constant 0 : index
    %c0_6 = arith.constant 0 : index
    %4 = vector.load %arg2[%c0_4, %c0_5, %c0_6] : memref<9x16x256xf32, #tpu.memory_space<vmem>>, vector<1x8x256xf32>
    %5 = vector.shape_cast %4 : vector<1x8x256xf32> to vector<8x256xf32>
    %6 = arith.mulf %3, %5 : vector<8x256xf32>
    %c0_7 = arith.constant 0 : index
    %c0_8 = arith.constant 0 : index
    %7 = vector.load %arg13[%c0_7, %c0_8] : memref<72x256xf32, #tpu.memory_space<vmem>>, vector<8x256xf32>
    tpu.vector_store %arg13[%c0_7, %c0_8], %6 {strides = array<i32>} : memref<72x256xf32, #tpu.memory_space<vmem>>, vector<8x256xf32>,
    %c16_i32 = arith.constant 16 : i32
    %8 = tpu.dynamic_rotate %2 by %c16_i32 dim 1 : vector<8x256xf32>, i32 -> vector<8x256xf32>
    %c1 = arith.constant 1 : index
    %c0_9 = arith.constant 0 : index
    %c0_10 = arith.constant 0 : index
    %9 = vector.load %arg2[%c1, %c0_9, %c0_10] : memref<9x16x256xf32, #tpu.memory_space<vmem>>, vector<1x8x256xf32>
    %10 = vector.shape_cast %9 : vector<1x8x256xf32> to vector<8x256xf32>
    %11 = arith.mulf %8, %10 : vector<8x256xf32>
    %c8 = arith.constant 8 : index
    %c0_11 = arith.constant 0 : index
    %12 = vector.load %arg13[%c8, %c0_11] : memref<72x256xf32, #tpu.memory_space<vmem>>, vector<8x256xf32>
    tpu.vector_store %arg13[%c8, %c0_11], %11 {strides = array<i32>} : memref<72x256xf32, #tpu.memory_space<vmem>>, vector<8x256xf32>,
    %c15_i32 = arith.constant 15 : i32
    %13 = tpu.dynamic_rotate %2 by %c15_i32 dim 1 : vector<8x256xf32>, i32 -> vector<8x256xf32>
    %c2 = arith.constant 2 : index
    %c0_12 = arith.constant 0 : index
    %c0_13 = arith.constant 0 : index
    %14 = vector.load %arg2[%c2, %c0_12, %c0_13] : memref<9x16x256xf32, #tpu.memory_space<vmem>>, vector<1x8x256xf32>
    %15 = vector.shape_cast %14 : vector<1x8x256xf32> to vector<8x256xf32>
    %16 = arith.mulf %13, %15 : vector<8x256xf32>
    %c16 = arith.constant 16 : index
    %c0_14 = arith.constant 0 : index
    %17 = vector.load %arg13[%c16, %c0_14] : memref<72x256xf32, #tpu.memory_space<vmem>>, vector<8x256xf32>
    tpu.vector_store %arg13[%c16, %c0_14], %16 {strides = array<i32>} : memref<72x256xf32, #tpu.memory_space<vmem>>, vector<8x256xf32>,
    %c1_i32 = arith.constant 1 : i32
    %18 = tpu.dynamic_rotate %2 by %c1_i32 dim 1 : vector<8x256xf32>, i32 -> vector<8x256xf32>
    %c3 = arith.constant 3 : index
    %c0_15 = arith.constant 0 : index
    %c0_16 = arith.constant 0 : index
    %19 = vector.load %arg2[%c3, %c0_15, %c0_16] : memref<9x16x256xf32, #tpu.memory_space<vmem>>, vector<1x8x256xf32>
    %20 = vector.shape_cast %19 : vector<1x8x256xf32> to vector<8x256xf32>
    %21 = arith.mulf %18, %20 : vector<8x256xf32>
    %c24 = arith.constant 24 : index
    %c0_17 = arith.constant 0 : index
    %22 = vector.load %arg13[%c24, %c0_17] : memref<72x256xf32, #tpu.memory_space<vmem>>, vector<8x256xf32>
    tpu.vector_store %arg13[%c24, %c0_17], %21 {strides = array<i32>} : memref<72x256xf32, #tpu.memory_space<vmem>>, vector<8x256xf32>,
    %c32 = arith.constant 32 : index
    %c0_18 = arith.constant 0 : index
    %23 = vector.load %arg13[%c32, %c0_18] : memref<72x256xf32, #tpu.memory_space<vmem>>, vector<8x256xf32>
    tpu.vector_store %arg13[%c32, %c0_18], %2 {strides = array<i32>} : memref<72x256xf32, #tpu.memory_space<vmem>>, vector<8x256xf32>,
    %c255_i32 = arith.constant 255 : i32
    %24 = tpu.dynamic_rotate %2 by %c255_i32 dim 1 : vector<8x256xf32>, i32 -> vector<8x256xf32>
    %c5 = arith.constant 5 : index
    %c0_19 = arith.constant 0 : index
    %c0_20 = arith.constant 0 : index
    %25 = vector.load %arg2[%c5, %c0_19, %c0_20] : memref<9x16x256xf32, #tpu.memory_space<vmem>>, vector<1x8x256xf32>
    %26 = vector.shape_cast %25 : vector<1x8x256xf32> to vector<8x256xf32>
    %27 = arith.mulf %24, %26 : vector<8x256xf32>
    %c40 = arith.constant 40 : index
    %c0_21 = arith.constant 0 : index
    %28 = vector.load %arg13[%c40, %c0_21] : memref<72x256xf32, #tpu.memory_space<vmem>>, vector<8x256xf32>
    tpu.vector_store %arg13[%c40, %c0_21], %27 {strides = array<i32>} : memref<72x256xf32, #tpu.memory_space<vmem>>, vector<8x256xf32>,
    %c241_i32 = arith.constant 241 : i32
    %29 = tpu.dynamic_rotate %2 by %c241_i32 dim 1 : vector<8x256xf32>, i32 -> vector<8x256xf32>
    %c6 = arith.constant 6 : index
    %c0_22 = arith.constant 0 : index
    %c0_23 = arith.constant 0 : index
    %30 = vector.load %arg2[%c6, %c0_22, %c0_23] : memref<9x16x256xf32, #tpu.memory_space<vmem>>, vector<1x8x256xf32>
    %31 = vector.shape_cast %30 : vector<1x8x256xf32> to vector<8x256xf32>
    %32 = arith.mulf %29, %31 : vector<8x256xf32>
    %c48 = arith.constant 48 : index
    %c0_24 = arith.constant 0 : index
    %33 = vector.load %arg13[%c48, %c0_24] : memref<72x256xf32, #tpu.memory_space<vmem>>, vector<8x256xf32>
    tpu.vector_store %arg13[%c48, %c0_24], %32 {strides = array<i32>} : memref<72x256xf32, #tpu.memory_space<vmem>>, vector<8x256xf32>,
    %c240_i32 = arith.constant 240 : i32
    %34 = tpu.dynamic_rotate %2 by %c240_i32 dim 1 : vector<8x256xf32>, i32 -> vector<8x256xf32>
    %c7 = arith.constant 7 : index
    %c0_25 = arith.constant 0 : index
    %c0_26 = arith.constant 0 : index
    %35 = vector.load %arg2[%c7, %c0_25, %c0_26] : memref<9x16x256xf32, #tpu.memory_space<vmem>>, vector<1x8x256xf32>
    %36 = vector.shape_cast %35 : vector<1x8x256xf32> to vector<8x256xf32>
    %37 = arith.mulf %34, %36 : vector<8x256xf32>
    %c56 = arith.constant 56 : index
    %c0_27 = arith.constant 0 : index
    %38 = vector.load %arg13[%c56, %c0_27] : memref<72x256xf32, #tpu.memory_space<vmem>>, vector<8x256xf32>
    tpu.vector_store %arg13[%c56, %c0_27], %37 {strides = array<i32>} : memref<72x256xf32, #tpu.memory_space<vmem>>, vector<8x256xf32>,
    %c239_i32 = arith.constant 239 : i32
    %39 = tpu.dynamic_rotate %2 by %c239_i32 dim 1 : vector<8x256xf32>, i32 -> vector<8x256xf32>
    %c8_28 = arith.constant 8 : index
    %c0_29 = arith.constant 0 : index
    %c0_30 = arith.constant 0 : index
    %40 = vector.load %arg2[%c8_28, %c0_29, %c0_30] : memref<9x16x256xf32, #tpu.memory_space<vmem>>, vector<1x8x256xf32>
    %41 = vector.shape_cast %40 : vector<1x8x256xf32> to vector<8x256xf32>
    %42 = arith.mulf %39, %41 : vector<8x256xf32>
    %c64 = arith.constant 64 : index
    %c0_31 = arith.constant 0 : index
    %43 = vector.load %arg13[%c64, %c0_31] : memref<72x256xf32, #tpu.memory_space<vmem>>, vector<8x256xf32>
    tpu.vector_store %arg13[%c64, %c0_31], %42 {strides = array<i32>} : memref<72x256xf32, #tpu.memory_space<vmem>>, vector<8x256xf32>,
    %c0_32 = arith.constant 0 : index
    %c0_33 = arith.constant 0 : index
    %44 = vector.load %arg4[%c0_32, %c0_33] : memref<16x1xf32, #tpu.memory_space<vmem>>, vector<16x1xf32>
    %c0_34 = arith.constant 0 : index
    %c0_35 = arith.constant 0 : index
    %45 = vector.load %arg5[%c0_34, %c0_35] : memref<16x1xf32, #tpu.memory_space<vmem>>, vector<16x1xf32>
    %c0_36 = arith.constant 0 : index
    %c0_37 = arith.constant 0 : index
    %46 = vector.load %arg6[%c0_36, %c0_37] : memref<16x1xf32, #tpu.memory_space<vmem>>, vector<16x1xf32>
    %c0_38 = arith.constant 0 : index
    %c0_39 = arith.constant 0 : index
    %47 = vector.load %arg3[%c0_38, %c0_39] : memref<16x72xf32, #tpu.memory_space<vmem>>, vector<16x72xf32>
    %c0_40 = arith.constant 0 : index
    %c0_41 = arith.constant 0 : index
    %48 = vector.load %arg13[%c0_40, %c0_41] : memref<72x256xf32, #tpu.memory_space<vmem>>, vector<72x256xf32>
    %cst = arith.constant dense<0.000000e+00> : vector<16x256xf32>
    %49 = tpu.matmul %47, %48, %cst {dimension_numbers = #tpu.dot_dimension_numbers<[1], [0], [0], [1], [0, 0, 1, 1], [], []>} : vector<16x72xf32>, vector<72x256xf32>, vector<16x256xf32> -> vector<16x256xf32>
    %50 = vector.broadcast %44 : vector<16x1xf32> to vector<16x256xf32>
    %51 = arith.addf %49, %50 : vector<16x256xf32>
    %cst_42 = arith.constant dense<0.000000e+00> : vector<16xf32>
    %52 = vector.multi_reduction <add>, %51, %cst_42 [1] : vector<16x256xf32> to vector<16xf32>
    %53 = vector.shape_cast %52 : vector<16xf32> to vector<16x1xf32>
    %54 = arith.mulf %51, %51 : vector<16x256xf32>
    %cst_43 = arith.constant dense<0.000000e+00> : vector<16xf32>
    %55 = vector.multi_reduction <add>, %54, %cst_43 [1] : vector<16x256xf32> to vector<16xf32>
    %56 = vector.shape_cast %55 : vector<16xf32> to vector<16x1xf32>
    %cst_44 = arith.constant dense<0.000000e+00> : vector<16x1xf32>
    %57 = tpu.matmul %0, %53, %cst_44 {dimension_numbers = #tpu.dot_dimension_numbers<[1], [0], [0], [1], [0, 0, 1, 1], [], []>} : vector<16x16xf32>, vector<16x1xf32>, vector<16x1xf32> -> vector<16x1xf32>
    %cst_45 = arith.constant dense<0.000000e+00> : vector<16x1xf32>
    %58 = tpu.matmul %0, %56, %cst_45 {dimension_numbers = #tpu.dot_dimension_numbers<[1], [0], [0], [1], [0, 0, 1, 1], [], []>} : vector<16x16xf32>, vector<16x1xf32>, vector<16x1xf32> -> vector<16x1xf32>
    %cst_46 = arith.constant 5.120000e+02 : f32
    %59 = vector.broadcast %cst_46 : f32 to vector<16x1xf32>
    %60 = arith.divf %57, %59 : vector<16x1xf32>
    %cst_47 = arith.constant 5.120000e+02 : f32
    %61 = vector.broadcast %cst_47 : f32 to vector<16x1xf32>
    %62 = arith.divf %58, %61 : vector<16x1xf32>
    %63 = arith.mulf %60, %60 : vector<16x1xf32>
    %64 = arith.subf %62, %63 : vector<16x1xf32>
    %cst_48 = arith.constant 9.99999974E-6 : f32
    %65 = vector.broadcast %cst_48 : f32 to vector<16x1xf32>
    %66 = arith.addf %64, %65 : vector<16x1xf32>
    %67 = math.rsqrt %66 : vector<16x1xf32>
    %68 = arith.mulf %45, %67 : vector<16x1xf32>
    %69 = arith.mulf %60, %68 : vector<16x1xf32>
    %70 = arith.subf %46, %69 : vector<16x1xf32>
    %71 = vector.broadcast %68 : vector<16x1xf32> to vector<16x256xf32>
    %72 = arith.mulf %51, %71 : vector<16x256xf32>
    %73 = vector.broadcast %70 : vector<16x1xf32> to vector<16x256xf32>
    %74 = arith.addf %72, %73 : vector<16x256xf32>
    %75 = arith.negf %74 : vector<16x256xf32>
    %76 = math.exp %75 : vector<16x256xf32>
    %cst_49 = arith.constant 1.000000e+00 : f32
    %77 = vector.broadcast %cst_49 : f32 to vector<16x256xf32>
    %78 = arith.addf %77, %76 : vector<16x256xf32>
    %79 = arith.divf %77, %78 : vector<16x256xf32>
    %80 = arith.mulf %74, %79 : vector<16x256xf32>
    %c17_i32_50 = arith.constant 17 : i32
    %81 = tpu.dynamic_rotate %80 by %c17_i32_50 dim 1 : vector<16x256xf32>, i32 -> vector<16x256xf32>
    %c0_51 = arith.constant 0 : index
    %c0_52 = arith.constant 0 : index
    %c0_53 = arith.constant 0 : index
    %82 = vector.load %arg2[%c0_51, %c0_52, %c0_53] : memref<9x16x256xf32, #tpu.memory_space<vmem>>, vector<1x16x256xf32>
    %83 = vector.shape_cast %82 : vector<1x16x256xf32> to vector<16x256xf32>
    %84 = arith.mulf %81, %83 : vector<16x256xf32>
    %c0_54 = arith.constant 0 : index
    %c0_55 = arith.constant 0 : index
    %85 = vector.load %arg14[%c0_54, %c0_55] : memref<144x256xf32, #tpu.memory_space<vmem>>, vector<16x256xf32>
    tpu.vector_store %arg14[%c0_54, %c0_55], %84 {strides = array<i32>} : memref<144x256xf32, #tpu.memory_space<vmem>>, vector<16x256xf32>,
    %c16_i32_56 = arith.constant 16 : i32
    %86 = tpu.dynamic_rotate %80 by %c16_i32_56 dim 1 : vector<16x256xf32>, i32 -> vector<16x256xf32>
    %c1_57 = arith.constant 1 : index
    %c0_58 = arith.constant 0 : index
    %c0_59 = arith.constant 0 : index
    %87 = vector.load %arg2[%c1_57, %c0_58, %c0_59] : memref<9x16x256xf32, #tpu.memory_space<vmem>>, vector<1x16x256xf32>
    %88 = vector.shape_cast %87 : vector<1x16x256xf32> to vector<16x256xf32>
    %89 = arith.mulf %86, %88 : vector<16x256xf32>
    %c16_60 = arith.constant 16 : index
    %c0_61 = arith.constant 0 : index
    %90 = vector.load %arg14[%c16_60, %c0_61] : memref<144x256xf32, #tpu.memory_space<vmem>>, vector<16x256xf32>
    tpu.vector_store %arg14[%c16_60, %c0_61], %89 {strides = array<i32>} : memref<144x256xf32, #tpu.memory_space<vmem>>, vector<16x256xf32>,
    %c15_i32_62 = arith.constant 15 : i32
    %91 = tpu.dynamic_rotate %80 by %c15_i32_62 dim 1 : vector<16x256xf32>, i32 -> vector<16x256xf32>
    %c2_63 = arith.constant 2 : index
    %c0_64 = arith.constant 0 : index
    %c0_65 = arith.constant 0 : index
    %92 = vector.load %arg2[%c2_63, %c0_64, %c0_65] : memref<9x16x256xf32, #tpu.memory_space<vmem>>, vector<1x16x256xf32>
    %93 = vector.shape_cast %92 : vector<1x16x256xf32> to vector<16x256xf32>
    %94 = arith.mulf %91, %93 : vector<16x256xf32>
    %c32_66 = arith.constant 32 : index
    %c0_67 = arith.constant 0 : index
    %95 = vector.load %arg14[%c32_66, %c0_67] : memref<144x256xf32, #tpu.memory_space<vmem>>, vector<16x256xf32>
    tpu.vector_store %arg14[%c32_66, %c0_67], %94 {strides = array<i32>} : memref<144x256xf32, #tpu.memory_space<vmem>>, vector<16x256xf32>,
    %c1_i32_68 = arith.constant 1 : i32
    %96 = tpu.dynamic_rotate %80 by %c1_i32_68 dim 1 : vector<16x256xf32>, i32 -> vector<16x256xf32>
    %c3_69 = arith.constant 3 : index
    %c0_70 = arith.constant 0 : index
    %c0_71 = arith.constant 0 : index
    %97 = vector.load %arg2[%c3_69, %c0_70, %c0_71] : memref<9x16x256xf32, #tpu.memory_space<vmem>>, vector<1x16x256xf32>
    %98 = vector.shape_cast %97 : vector<1x16x256xf32> to vector<16x256xf32>
    %99 = arith.mulf %96, %98 : vector<16x256xf32>
    %c48_72 = arith.constant 48 : index
    %c0_73 = arith.constant 0 : index
    %100 = vector.load %arg14[%c48_72, %c0_73] : memref<144x256xf32, #tpu.memory_space<vmem>>, vector<16x256xf32>
    tpu.vector_store %arg14[%c48_72, %c0_73], %99 {strides = array<i32>} : memref<144x256xf32, #tpu.memory_space<vmem>>, vector<16x256xf32>,
    %c64_74 = arith.constant 64 : index
    %c0_75 = arith.constant 0 : index
    %101 = vector.load %arg14[%c64_74, %c0_75] : memref<144x256xf32, #tpu.memory_space<vmem>>, vector<16x256xf32>
    tpu.vector_store %arg14[%c64_74, %c0_75], %80 {strides = array<i32>} : memref<144x256xf32, #tpu.memory_space<vmem>>, vector<16x256xf32>,
    %c255_i32_76 = arith.constant 255 : i32
    %102 = tpu.dynamic_rotate %80 by %c255_i32_76 dim 1 : vector<16x256xf32>, i32 -> vector<16x256xf32>
    %c5_77 = arith.constant 5 : index
    %c0_78 = arith.constant 0 : index
    %c0_79 = arith.constant 0 : index
    %103 = vector.load %arg2[%c5_77, %c0_78, %c0_79] : memref<9x16x256xf32, #tpu.memory_space<vmem>>, vector<1x16x256xf32>
    %104 = vector.shape_cast %103 : vector<1x16x256xf32> to vector<16x256xf32>
    %105 = arith.mulf %102, %104 : vector<16x256xf32>
    %c80 = arith.constant 80 : index
    %c0_80 = arith.constant 0 : index
    %106 = vector.load %arg14[%c80, %c0_80] : memref<144x256xf32, #tpu.memory_space<vmem>>, vector<16x256xf32>
    tpu.vector_store %arg14[%c80, %c0_80], %105 {strides = array<i32>} : memref<144x256xf32, #tpu.memory_space<vmem>>, vector<16x256xf32>,
    %c241_i32_81 = arith.constant 241 : i32
    %107 = tpu.dynamic_rotate %80 by %c241_i32_81 dim 1 : vector<16x256xf32>, i32 -> vector<16x256xf32>
    %c6_82 = arith.constant 6 : index
    %c0_83 = arith.constant 0 : index
    %c0_84 = arith.constant 0 : index
    %108 = vector.load %arg2[%c6_82, %c0_83, %c0_84] : memref<9x16x256xf32, #tpu.memory_space<vmem>>, vector<1x16x256xf32>
    %109 = vector.shape_cast %108 : vector<1x16x256xf32> to vector<16x256xf32>
    %110 = arith.mulf %107, %109 : vector<16x256xf32>
    %c96 = arith.constant 96 : index
    %c0_85 = arith.constant 0 : index
    %111 = vector.load %arg14[%c96, %c0_85] : memref<144x256xf32, #tpu.memory_space<vmem>>, vector<16x256xf32>
    tpu.vector_store %arg14[%c96, %c0_85], %110 {strides = array<i32>} : memref<144x256xf32, #tpu.memory_space<vmem>>, vector<16x256xf32>,
    %c240_i32_86 = arith.constant 240 : i32
    %112 = tpu.dynamic_rotate %80 by %c240_i32_86 dim 1 : vector<16x256xf32>, i32 -> vector<16x256xf32>
    %c7_87 = arith.constant 7 : index
    %c0_88 = arith.constant 0 : index
    %c0_89 = arith.constant 0 : index
    %113 = vector.load %arg2[%c7_87, %c0_88, %c0_89] : memref<9x16x256xf32, #tpu.memory_space<vmem>>, vector<1x16x256xf32>
    %114 = vector.shape_cast %113 : vector<1x16x256xf32> to vector<16x256xf32>
    %115 = arith.mulf %112, %114 : vector<16x256xf32>
    %c112 = arith.constant 112 : index
    %c0_90 = arith.constant 0 : index
    %116 = vector.load %arg14[%c112, %c0_90] : memref<144x256xf32, #tpu.memory_space<vmem>>, vector<16x256xf32>
    tpu.vector_store %arg14[%c112, %c0_90], %115 {strides = array<i32>} : memref<144x256xf32, #tpu.memory_space<vmem>>, vector<16x256xf32>,
    %c239_i32_91 = arith.constant 239 : i32
    %117 = tpu.dynamic_rotate %80 by %c239_i32_91 dim 1 : vector<16x256xf32>, i32 -> vector<16x256xf32>
    %c8_92 = arith.constant 8 : index
    %c0_93 = arith.constant 0 : index
    %c0_94 = arith.constant 0 : index
    %118 = vector.load %arg2[%c8_92, %c0_93, %c0_94] : memref<9x16x256xf32, #tpu.memory_space<vmem>>, vector<1x16x256xf32>
    %119 = vector.shape_cast %118 : vector<1x16x256xf32> to vector<16x256xf32>
    %120 = arith.mulf %117, %119 : vector<16x256xf32>
    %c128 = arith.constant 128 : index
    %c0_95 = arith.constant 0 : index
    %121 = vector.load %arg14[%c128, %c0_95] : memref<144x256xf32, #tpu.memory_space<vmem>>, vector<16x256xf32>
    tpu.vector_store %arg14[%c128, %c0_95], %120 {strides = array<i32>} : memref<144x256xf32, #tpu.memory_space<vmem>>, vector<16x256xf32>,
    %c0_96 = arith.constant 0 : index
    %c0_97 = arith.constant 0 : index
    %122 = vector.load %arg8[%c0_96, %c0_97] : memref<16x1xf32, #tpu.memory_space<vmem>>, vector<16x1xf32>
    %c0_98 = arith.constant 0 : index
    %c0_99 = arith.constant 0 : index
    %123 = vector.load %arg9[%c0_98, %c0_99] : memref<16x1xf32, #tpu.memory_space<vmem>>, vector<16x1xf32>
    %c0_100 = arith.constant 0 : index
    %c0_101 = arith.constant 0 : index
    %124 = vector.load %arg10[%c0_100, %c0_101] : memref<16x1xf32, #tpu.memory_space<vmem>>, vector<16x1xf32>
    %c0_102 = arith.constant 0 : index
    %c0_103 = arith.constant 0 : index
    %125 = vector.load %arg7[%c0_102, %c0_103] : memref<16x144xf32, #tpu.memory_space<vmem>>, vector<16x144xf32>
    %c0_104 = arith.constant 0 : index
    %c0_105 = arith.constant 0 : index
    %126 = vector.load %arg14[%c0_104, %c0_105] : memref<144x256xf32, #tpu.memory_space<vmem>>, vector<144x256xf32>
    %cst_106 = arith.constant dense<0.000000e+00> : vector<16x256xf32>
    %127 = tpu.matmul %125, %126, %cst_106 {dimension_numbers = #tpu.dot_dimension_numbers<[1], [0], [0], [1], [0, 0, 1, 1], [], []>} : vector<16x144xf32>, vector<144x256xf32>, vector<16x256xf32> -> vector<16x256xf32>
    %128 = vector.broadcast %122 : vector<16x1xf32> to vector<16x256xf32>
    %129 = arith.addf %127, %128 : vector<16x256xf32>
    %cst_107 = arith.constant dense<0.000000e+00> : vector<16xf32>
    %130 = vector.multi_reduction <add>, %129, %cst_107 [1] : vector<16x256xf32> to vector<16xf32>
    %131 = vector.shape_cast %130 : vector<16xf32> to vector<16x1xf32>
    %132 = arith.mulf %129, %129 : vector<16x256xf32>
    %cst_108 = arith.constant dense<0.000000e+00> : vector<16xf32>
    %133 = vector.multi_reduction <add>, %132, %cst_108 [1] : vector<16x256xf32> to vector<16xf32>
    %134 = vector.shape_cast %133 : vector<16xf32> to vector<16x1xf32>
    %cst_109 = arith.constant dense<0.000000e+00> : vector<16x1xf32>
    %135 = tpu.matmul %0, %131, %cst_109 {dimension_numbers = #tpu.dot_dimension_numbers<[1], [0], [0], [1], [0, 0, 1, 1], [], []>} : vector<16x16xf32>, vector<16x1xf32>, vector<16x1xf32> -> vector<16x1xf32>
    %cst_110 = arith.constant dense<0.000000e+00> : vector<16x1xf32>
    %136 = tpu.matmul %0, %134, %cst_110 {dimension_numbers = #tpu.dot_dimension_numbers<[1], [0], [0], [1], [0, 0, 1, 1], [], []>} : vector<16x16xf32>, vector<16x1xf32>, vector<16x1xf32> -> vector<16x1xf32>
    %cst_111 = arith.constant 5.120000e+02 : f32
    %137 = vector.broadcast %cst_111 : f32 to vector<16x1xf32>
    %138 = arith.divf %135, %137 : vector<16x1xf32>
    %cst_112 = arith.constant 5.120000e+02 : f32
    %139 = vector.broadcast %cst_112 : f32 to vector<16x1xf32>
    %140 = arith.divf %136, %139 : vector<16x1xf32>
    %141 = arith.mulf %138, %138 : vector<16x1xf32>
    %142 = arith.subf %140, %141 : vector<16x1xf32>
    %cst_113 = arith.constant 9.99999974E-6 : f32
    %143 = vector.broadcast %cst_113 : f32 to vector<16x1xf32>
    %144 = arith.addf %142, %143 : vector<16x1xf32>
    %145 = math.rsqrt %144 : vector<16x1xf32>
    %146 = arith.mulf %123, %145 : vector<16x1xf32>
    %147 = arith.mulf %138, %146 : vector<16x1xf32>
    %148 = arith.subf %124, %147 : vector<16x1xf32>
    %149 = vector.broadcast %146 : vector<16x1xf32> to vector<16x256xf32>
    %150 = arith.mulf %129, %149 : vector<16x256xf32>
    %151 = vector.broadcast %148 : vector<16x1xf32> to vector<16x256xf32>
    %152 = arith.addf %150, %151 : vector<16x256xf32>
    %153 = arith.negf %152 : vector<16x256xf32>
    %154 = math.exp %153 : vector<16x256xf32>
    %cst_114 = arith.constant 1.000000e+00 : f32
    %155 = vector.broadcast %cst_114 : f32 to vector<16x256xf32>
    %156 = arith.addf %155, %154 : vector<16x256xf32>
    %157 = arith.divf %155, %156 : vector<16x256xf32>
    %158 = arith.mulf %152, %157 : vector<16x256xf32>
    %c0_115 = arith.constant 0 : index
    %c0_116 = arith.constant 0 : index
    %c0_117 = arith.constant 0 : index
    %159 = vector.load %arg12[%c0_115, %c0_116, %c0_117] : memref<1x16x256xf32, #tpu.memory_space<vmem>>, vector<1x16x256xf32>
    %160 = vector.shape_cast %159 : vector<1x16x256xf32> to vector<16x256xf32>
    %161 = vector.shape_cast %158 : vector<16x256xf32> to vector<1x16x256xf32>
    tpu.vector_store %arg12[%c0_115, %c0_116, %c0_117], %161 {strides = array<i32>} : memref<1x16x256xf32, #tpu.memory_space<vmem>>, vector<1x16x256xf32>,
    return
  }
  func.func @transform_0(%arg0: i32) -> (i32, i32, i32) {
    %c0_i32 = arith.constant 0 : i32
    %c0_i32_0 = arith.constant 0 : i32
    %c0_i32_1 = arith.constant 0 : i32
    return %arg0, %c0_i32, %c0_i32_0 : i32, i32, i32
  }
  func.func @transform_1(%arg0: i32) -> (i32, i32, i32) {
    %c0_i32 = arith.constant 0 : i32
    %c0_i32_0 = arith.constant 0 : i32
    %c0_i32_1 = arith.constant 0 : i32
    %c0_i32_2 = arith.constant 0 : i32
    return %c0_i32, %c0_i32_0, %c0_i32_1 : i32, i32, i32
  }
  func.func @transform_2(%arg0: i32) -> (i32, i32) {
    %c0_i32 = arith.constant 0 : i32
    %c0_i32_0 = arith.constant 0 : i32
    %c0_i32_1 = arith.constant 0 : i32
    return %c0_i32, %c0_i32_0 : i32, i32
  }
  func.func @transform_3(%arg0: i32) -> (i32, i32) {
    %c0_i32 = arith.constant 0 : i32
    %c0_i32_0 = arith.constant 0 : i32
    %c0_i32_1 = arith.constant 0 : i32
    return %c0_i32, %c0_i32_0 : i32, i32
  }
  func.func @transform_4(%arg0: i32) -> (i32, i32) {
    %c0_i32 = arith.constant 0 : i32
    %c0_i32_0 = arith.constant 0 : i32
    %c0_i32_1 = arith.constant 0 : i32
    return %c0_i32, %c0_i32_0 : i32, i32
  }
  func.func @transform_5(%arg0: i32) -> (i32, i32) {
    %c0_i32 = arith.constant 0 : i32
    %c0_i32_0 = arith.constant 0 : i32
    %c0_i32_1 = arith.constant 0 : i32
    return %c0_i32, %c0_i32_0 : i32, i32
  }
  func.func @transform_6(%arg0: i32) -> (i32, i32) {
    %c0_i32 = arith.constant 0 : i32
    %c0_i32_0 = arith.constant 0 : i32
    %c0_i32_1 = arith.constant 0 : i32
    return %c0_i32, %c0_i32_0 : i32, i32
  }
  func.func @transform_7(%arg0: i32) -> (i32, i32) {
    %c0_i32 = arith.constant 0 : i32
    %c0_i32_0 = arith.constant 0 : i32
    %c0_i32_1 = arith.constant 0 : i32
    return %c0_i32, %c0_i32_0 : i32, i32
  }
  func.func @transform_8(%arg0: i32) -> (i32, i32) {
    %c0_i32 = arith.constant 0 : i32
    %c0_i32_0 = arith.constant 0 : i32
    %c0_i32_1 = arith.constant 0 : i32
    return %c0_i32, %c0_i32_0 : i32, i32
  }
  func.func @transform_9(%arg0: i32) -> (i32, i32) {
    %c0_i32 = arith.constant 0 : i32
    %c0_i32_0 = arith.constant 0 : i32
    %c0_i32_1 = arith.constant 0 : i32
    return %c0_i32, %c0_i32_0 : i32, i32
  }
  func.func @transform_10(%arg0: i32) -> (i32, i32) {
    %c0_i32 = arith.constant 0 : i32
    %c0_i32_0 = arith.constant 0 : i32
    %c0_i32_1 = arith.constant 0 : i32
    return %c0_i32, %c0_i32_0 : i32, i32
  }
  func.func @transform_11(%arg0: i32) -> (i32, i32, i32) {
    %c0_i32 = arith.constant 0 : i32
    %c0_i32_0 = arith.constant 0 : i32
    %c0_i32_1 = arith.constant 0 : i32
    return %arg0, %c0_i32, %c0_i32_0 : i32, i32, i32
  }
}

</mosaic_0001>

<bundles_post_ra>
// kernel: tpu_custom_call.1
= control target key start
LH: loop header
LB: loop body
LE: loop exit
PB: predicated region body
PF: predicated region fallthrough
CT: control target
= control target key end

     0   :  { %s2381_s0 = inlined_call_operand.vmem [shape: f32[2,8,256], index: 0, kind: input, shape index: {}]   ;;  %s2382_s1 = inlined_call_operand.hbm [shape: f32[9,16,256], index: 1, kind: input, shape index: {}]   ;;  %s2383_s2 = inlined_call_operand.vmem [shape: f32[16,72], index: 2, kind: input, shape index: {}]   ;;  %s2384_s3 = inlined_call_operand.vmem [shape: f32[16,1], index: 3, kind: input, shape index: {}]   ;;  %s2385_s4 = inlined_call_operand.vmem [shape: f32[16,1], index: 4, kind: input, shape index: {}]   ;;  %s2386_s5 = inlined_call_operand.vmem [shape: f32[16,1], index: 5, kind: input, shape index: {}]   ;;  %s2387_s6 = inlined_call_operand.vmem [shape: f32[16,144], index: 6, kind: input, shape index: {}]   ;;  %s2388_s7 = inlined_call_operand.vmem [shape: f32[16,1], index: 7, kind: input, shape index: {}]   ;;  %s2389_s8 = inlined_call_operand.vmem [shape: f32[16,1], index: 8, kind: input, shape index: {}]   ;;  %s2390_s9 = inlined_call_operand.vmem [shape: f32[16,1], index: 9, kind: input, shape index: {}]   ;;  %s2391_s10 = inlined_call_operand.vmem [shape: f32[16,16], index: 10, kind: input, shape index: {}]   ;;  %s2392_s11 = inlined_call_operand.hbm [shape: f32[2,16,256], index: 11, kind: output, shape index: {}]  }
   0x1   :  { %2402 = sst [smem:[#allocation10_spill]] %s2381_s0 }
   0x2   :  { %2403 = sst [smem:[#allocation11_spill]] %s2382_s1 }
   0x3   :  { %16 = vsyncpa [#allocation5], 0 }
   0x4   :  { %17 = vsyncpa [#allocation6], 0 }
   0x5   :  { %19 = vsyncpa [#allocation6 + $0x1], 0  ;;  %s1800_s17 = smov 0   ;;  %s1802_s18 = smov 0  }
   0x6   :  { %s1804_s19 = smov 0   ;;  %s1806_s20 = smov 0  }
   0x7 LB: > { %s1821_s21 = sadd.s32 4294967295, %s1724_s20   ;;  %s1480_s22 = sadd.s32 4294967294, %s1724_s20   ;;  %s1724_s20 = sphi %s1806_s20, %s2423_s20   ;;  %s1720_s19 = sphi %s1804_s19, %s2422_s19   ;;  %s1716_s18 = sphi %s1802_s18, %s2421_s18   ;;  %s1712_s17 = sphi %s1800_s17, %s2420_s17  }
   0x8   : > { %s1825_s23 = sadd.s32 1, %s1724_s20   ;;  %s268_s24 = sadd.s32 1, %s1720_s19 }
   0x9   : > { %s265_s25 = ssub.s32 %s1724_s20, %s1825_s23  ;;  %p278_p0 = scmp.ne.s32.totalorder %s1720_s19, %s1716_s18 }
   0xa   : > { %p266_p1 = scmp.eq.s32.totalorder %s265_s25, 0  ;;  %p279_p2 = scmp.eq.s32.totalorder %s1821_s21, 1 }
   0xb   : > { %p284_p3 = scmp.ne.s32.totalorder %s1716_s18, %s1712_s17  ;;  %p285_p4 = scmp.eq.s32.totalorder %s1480_s22, 1 }
   0xc   : > { %s1836_s26 = scalar_select %p266_p1, %s1720_s19, %s268_s24  }
   0xd   : > { %p1838_p5 = por %p279_p2, %p278_p0  ;;  %p1842_p6 = por %p285_p4, %p284_p3 }
   0xe   : > { %p1481_p7 = scmp.ge.s32.totalorder %s1724_s20, 1  ;;  %p292_p8 = scmp.lt.s32.totalorder %s1724_s20, 3 }
   0xf   : > { %p1534_p9 = scmp.eq.s32.totalorder %s1821_s21, 0  ;;  %s2406_s1 = sld [smem:[#allocation11_spill]] }
  0x10   : > { %p293_p10 = pnand %p1481_p7, %p292_p8  ;;  %s1726_s13 = smov [#allocation4]  }
  0x11   : > { %s305_s14 = sshll.u32 %s1726_s13, 4  ;;  %s1727_s15 = smov 256   ;;  %s306_s14 = int_to_ptr.vmem [resolvable:$true] %s305_s14 }
  0x12   : > { %p1526_p11 = pneg %p293_p10  ;;  %s1728_s16 = smov 16  }
  0x13   : > { %356 = sbr.rel (%p293_p10) target bundleno = 1561 (0x619), region = 64 }
  0x14   : > { %p1527_p12 = pnand %p1534_p9, %p1526_p11 }
  0x15   : > { %s303_s12 = sshll.u32 %s2406_s1, 4  ;;  %s304_s12 = int_to_ptr.hbm [resolvable:$true] %s303_s12 }
  0x16   : > { %1529 = dma.hbm_to_vmem [thread:$0]  (!%p1527_p12), %s304_s12, 4608, %s306_s14, [#allocation5], %s1727_s15, %s1727_s15, %s1728_s16  }
  0x18   : > { %1703 = dma.done.wait (%p1534_p9), [#allocation5], 4608  }
  0x19   : > { %1705 = vsyncadd (%p1534_p9), [#allocation5], 4294962688  ;;  %p397_p13 = scmp.lt.s32.totalorder %s1821_s21, 1  ;;  %s2407_s0 = sld [smem:[#allocation10_spill]]  ;;  %v410_v3 = vlaneseq  ;;  %v1903_v8 = vld [vmem:[#allocation4 + $0x100] sm:$0xff]  ;;  %v1905_v9 = vld [vmem:[#allocation4 + $0x108] sm:$0xff] }
  0x1a   : > { %s1729_s13 = smov 112   ;;  %s2393_s12 = smov 111   ;;  %v1916_v16 = vld [vmem:[#allocation4 + $0xe0] sm:$0xff]  ;;  %v1918_v17 = vld [vmem:[#allocation4 + $0xe8] sm:$0xff]  ;;  %v1737_v44 = vmov 0   ;;  %vm557_vm8 = vcmask 588800  }
  0x1b   : > { %s398_s22 = scalar_select %p397_p13, %s1821_s21, 1  ;;  %v1899_v6 = vand.u32 127, %v410_v3  ;;  %v1926_v22 = vld [vmem:[#allocation4 + $0xc0] sm:$0xff]  ;;  %v1928_v23 = vld [vmem:[#allocation4 + $0xc8] sm:$0xff]  ;;  %1583 = vset.pattern.permute.xlu1 %v1737_v44  ;;  %1584 = vset.pattern.permute.xlu2 %v1737_v44  ;;  %vm2401_vm9 = vcmask 130048  }
  0x1c   : > { %s1731_s14 = smov 113   ;;  %s1732_s15 = smov 127   ;;  %v1935_v29 = vld [vmem:[#allocation4 + $0xa0] sm:$0xff]  ;;  %v1937_v30 = vld [vmem:[#allocation4 + $0xa8] sm:$0xff]  ;;  %1585 = vset.pattern.permute.xlu0 %v1737_v44 }
  0x1d   : > { %s1518_s24 = sshll.u32 %s398_s22, 4  ;;  %s1733_s16 = smov 1   ;;  %vm497_vm0 = vcmp.lt.s32.totalorder %v1899_v6, 112  ;;  %vm511_vm1 = vcmp.lt.s32.totalorder %v1899_v6, 111  ;;  %vm483_vm2 = vcmp.lt.s32.totalorder %v1899_v6, 113  ;;  %vm469_vm3 = vcmp.lt.s32.totalorder %v1899_v6, 127 }
  0x1e   : > { %s2399_s22 = smov 15   ;;  %s2395_s25 = smov 17   ;;  %v522_v37 = vld [vmem:[%s2384_s3 + $0x8] sm:$0xff]  ;;  %v521_v38 = vld [vmem:[%s2384_s3] sm:$0xff]  ;;  %vm453_vm4 = vcmp.lt.s32.totalorder %v1899_v6, 1  ;;  %vm439_vm5 = vcmp.lt.s32.totalorder %v1899_v6, 15 }
  0x1f   : > { %s401_s30 = scalar_lea.vmem %s2407_s0, %s1518_s24  ;;  %s2397_s24 = smov 16   ;;  %v1954_v39 = vld [vmem:[#allocation4 + $0x60] sm:$0xff]  ;;  %v1957_v41 = vld [vmem:[#allocation4 + $0x68] sm:$0xff]  ;;  %vm425_vm6 = vcmp.lt.s32.totalorder %v1899_v6, 16  ;;  %vm412_vm7 = vcmp.lt.s32.totalorder %v1899_v6, 17 }
  0x20   : > { %v1863_v0 = vld [vmem:[%s401_s30] sm:$0xff]  ;;  %v1871_v1 = vld [vmem:[%s401_s30 + $0x8] sm:$0xff]  ;;  %s2410_s29 = smov 17  }
  0x21   : > { %493 = vrot.lane.b32.xlu1 %v1863_v0, %s1729_s13  ;;  %507 = vrot.lane.b32.xlu0 %v1863_v0, %s2393_s12  ;;  %v1959_v42 = vld [vmem:[#allocation4 + $0x40] sm:$0xff]  ;;  %v1961_v43 = vld [vmem:[#allocation4 + $0x48] sm:$0xff] }
  0x22   : > { %479 = vrot.lane.b32.xlu2 %v1863_v0, %s1731_s14  ;;  %v1976_v55 = vld [vmem:[#allocation4 + $0x20] sm:$0xff]  ;;  %v1978_v56 = vld [vmem:[#allocation4 + $0x28] sm:$0xff] }
  0x23   : > { %v2033_v44 = vld [vmem:[%s2391_s10 + $0x8] sm:$0xff] }
  0x29   : > { %495 = vrot.lane.b32.xlu1 %v1871_v1, %s1729_s13  ;;  %509 = vrot.lane.b32.xlu0 %v1871_v1, %s2393_s12 }
  0x2a   : > { %481 = vrot.lane.b32.xlu2 %v1871_v1, %s1731_s14 }
  0x31   : > { %467 = vrot.lane.b32.xlu1 %v1871_v1, %s1732_s15  ;;  %465 = vrot.lane.b32.xlu0 %v1863_v0, %s1732_s15 }
  0x32   : > { %449 = vrot.lane.b32.xlu2 %v1863_v0, %s1733_s16 }
  0x39   : > { %435 = vrot.lane.b32.xlu1 %v1863_v0, %s2399_s22  ;;  %451 = vrot.lane.b32.xlu0 %v1871_v1, %s1733_s16 }
  0x3a   : > { %437 = vrot.lane.b32.xlu2 %v1871_v1, %s2399_s22  ;;  %s2408_s22 = smov 15  }
  0x41   : > { %423 = vrot.lane.b32.xlu1 %v1871_v1, %s2397_s24  ;;  %421 = vrot.lane.b32.xlu0 %v1863_v0, %s2397_s24  ;;  %s2409_s24 = smov 16  }
  0x42   : > { %406 = vrot.lane.b32.xlu2 %v1863_v0, %s2395_s25 }
  0x49   : > { %408 = vrot.lane.b32.xlu0 %v1871_v1, %s2395_s25  ;;  %554 = vperm.xlu1 %1583, %v522_v37   ;;  %v2026_v37 = vld [vmem:[%s2391_s10] sm:$0xff]  ;;  %s1519_s25 = sshll.u32 %s1821_s21, 5 }
  0x4a   : > { %549 = vperm.xlu2 %1584, %v521_v38  }
  0x7c   : > { %v480_v2 = vpop.permute.xlu2 %479 }
  0x84   : > { %v482_v7 = vpop.permute.xlu2 %481 }
  0x85   : > { %v484_v20 = vsel %vm483_vm2, %v480_v2, %v482_v7  ;;  %v485_v21 = vsel %vm483_vm2, %v482_v7, %v480_v2 }
  0x86   : > { %v489_v27 = vmul.f32 %v1926_v22, %v484_v20  ;;  %v490_v28 = vmul.f32 %v1928_v23, %v485_v21 }
  0x8c   : > { %v450_v26 = vpop.permute.xlu2 %449 }
  0x93   : > { %v494_v4 = vpop.permute.xlu1 %493  ;;  %v508_v5 = vpop.permute.xlu0 %507 }
  0x94   : > { %v438_v40 = vpop.permute.xlu2 %437 }
  0x9b   : > { %v496_v10 = vpop.permute.xlu1 %495  ;;  %v510_v11 = vpop.permute.xlu0 %509 }
  0x9c   : > { %v498_v12 = vsel %vm497_vm0, %v494_v4, %v496_v10  ;;  %v499_v13 = vsel %vm497_vm0, %v496_v10, %v494_v4  ;;  %v512_v14 = vsel %vm511_vm1, %v508_v5, %v510_v11  ;;  %v513_v15 = vsel %vm511_vm1, %v510_v11, %v508_v5  ;;  %v407_v63 = vpop.permute.xlu2 %406  ;;  %v527_v10 = vld [vmem:[%s2383_s2] sm:$0xff]  ;;  %v528_v11 = vld [vmem:[%s2383_s2 + $0x8] sm:$0xff] }
  0x9d   : > { %v517_v18 = vmul.f32 %v1903_v8, %v512_v14  ;;  %v518_v19 = vmul.f32 %v1905_v9, %v513_v15  ;;  %v503_v24 = vmul.f32 %v1916_v16, %v498_v12  ;;  %v504_v25 = vmul.f32 %v1918_v17, %v499_v13 }
  0x9f   : > { %571 = vmatpush.msra.mxu0 %v517_v18  ;;  %594 = vmatpush.msra.mxu1 %v518_v19 }
  0xa1   : > { %572 = vmatpush.msra.mxu0 %v503_v24  ;;  %595 = vmatpush.msra.mxu1 %v504_v25 }
  0xa3   : > { %v468_v31 = vpop.permute.xlu1 %467  ;;  %573 = vmatpush.msra.mxu0 %v489_v27  ;;  %596 = vmatpush.msra.mxu1 %v490_v28  ;;  %v466_v32 = vpop.permute.xlu0 %465 }
  0xa4   : > { %v470_v33 = vsel %vm469_vm3, %v466_v32, %v468_v31  ;;  %v471_v34 = vsel %vm469_vm3, %v468_v31, %v466_v32  ;;  %v550_v12 = vpop.permute.xlu2 %549 }
  0xa5   : > { %v475_v35 = vmul.f32 %v1935_v29, %v470_v33  ;;  %v476_v36 = vmul.f32 %v1937_v30, %v471_v34 }
  0xa7   : > { %574 = vmatpush.msra.mxu0 %v475_v35  ;;  %597 = vmatpush.msra.mxu1 %v476_v36 }
  0xa9   : > { %575 = vmatpush.msra.mxu0 %v1863_v0  ;;  %598 = vmatpush.msra.mxu1 %v1871_v1  ;;  %v1987_v0 = vld [vmem:[#allocation4] sm:$0xff]  ;;  %v1989_v1 = vld [vmem:[#allocation4 + $0x8] sm:$0xff] }
  0xab   : > { %v436_v45 = vpop.permute.xlu1 %435  ;;  %v452_v46 = vpop.permute.xlu0 %451 }
  0xac   : > { %v454_v47 = vsel %vm453_vm4, %v450_v26, %v452_v46  ;;  %v455_v48 = vsel %vm453_vm4, %v452_v46, %v450_v26  ;;  %v440_v49 = vsel %vm439_vm5, %v436_v45, %v438_v40  ;;  %v441_v50 = vsel %vm439_vm5, %v438_v40, %v436_v45 }
  0xad   : > { %v459_v51 = vmul.f32 %v1954_v39, %v455_v48  ;;  %v460_v52 = vmul.f32 %v1957_v41, %v454_v47  ;;  %v445_v53 = vmul.f32 %v1959_v42, %v441_v50  ;;  %v446_v54 = vmul.f32 %v1961_v43, %v440_v49 }
  0xae   : > { %v1738_v46 = vmov 512.0  }
  0xaf   : > { %576 = vmatpush.msra.mxu0 %v459_v51  ;;  %599 = vmatpush.msra.mxu1 %v460_v52  ;;  %1586 = vrcp.f32 %v1738_v46 }
  0xb1   : > { %577 = vmatpush.msra.mxu0 %v445_v53  ;;  %600 = vmatpush.msra.mxu1 %v446_v54 }
  0xb3   : > { %v424_v57 = vpop.permute.xlu1 %423  ;;  %v422_v58 = vpop.permute.xlu0 %421 }
  0xb4   : > { %v426_v59 = vsel %vm425_vm6, %v422_v58, %v424_v57  ;;  %v427_v60 = vsel %vm425_vm6, %v424_v57, %v422_v58 }
  0xb5   : > { %v431_v61 = vmul.f32 %v1976_v55, %v427_v60  ;;  %v432_v62 = vmul.f32 %v1978_v56, %v426_v59  ;;  %v1587_v47 = vpop.eup %1586 }
  0xb6   : > { %v680_v48 = vmul.f32 512.0, %v1587_v47  ;;  %vm684_vm10 = vweird.f32 %v1587_v47 }
  0xb7   : > { %578 = vmatpush.msra.mxu0 %v431_v61  ;;  %601 = vmatpush.msra.mxu1 %v432_v62 }
  0xb8   : > { %v681_v49 = vsub.f32 1.0, %v680_v48 }
  0xba   : > { %v682_v50 = vmul.f32 %v1587_v47, %v681_v49 }
  0xbb   : > { %v409_v2 = vpop.permute.xlu0 %408  ;;  %v555_v20 = vpop.permute.xlu1 %554 }
  0xbc   : > { %v413_v3 = vsel %vm412_vm7, %v407_v63, %v409_v2  ;;  %v414_v4 = vsel %vm412_vm7, %v409_v2, %v407_v63  ;;  %v683_v51 = vadd.f32 %v1587_v47, %v682_v50 }
  0xbd   : > { %v417_v5 = vmul.f32 %v1987_v0, %v414_v4  ;;  %v418_v7 = vmul.f32 %v1989_v1, %v413_v3 }
  0xbe   : > { %v2041_v53 = vsel %vm684_vm10, %v1587_v47, %v683_v51  ;;  %v526_v47 = vld [vmem:[%s2386_s5 + $0x8] sm:$0xff] }
  0xbf   : > { %579 = vmatpush.msra.mxu0 %v417_v5  ;;  %602 = vmatpush.msra.mxu1 %v418_v7 }
  0xc0   : > { %1489 = vmatmul.msk.f32.vlgmr.msra.gmra.mxu0 %vm557_vm8, %v527_v10  ;;  %1491 = vmatmul.msk.f32.vlgmr.msra.gmra.mxu1 %vm557_vm8, %v527_v10 }
  0xc8   : > { %1490 = vmatmul.msk.f32.gmra.mxu0 %vm557_vm8, %v528_v11  ;;  %1492 = vmatmul.msk.f32.gmra.mxu1 %vm557_vm8, %v528_v11 }
 0x13d   : > { %v581_v13 = vpop.f32.mrf.mxu0  ;;  %v604_v14 = vpop.f32.mrf.mxu1 }
 0x13e   : > { %v2003_v15 = vadd.f32 %v581_v13, %v550_v12  ;;  %v2005_v18 = vadd.f32 %v604_v14, %v550_v12 }
 0x140   : > { %v610_v19 = vadd.f32 %v2005_v18, %v2003_v15  ;;  %v616_v33 = vmul.f32 %v2003_v15, %v2003_v15  ;;  %v617_v34 = vmul.f32 %v2005_v18, %v2005_v18 }
 0x142   : > { %611 = vadd.xlane.f32.xlu1 %v610_v19  ;;  %v620_v35 = vadd.f32 %v617_v34, %v616_v33 }
 0x145   : > { %v584_v21 = vpop.f32.mrf.mxu0  ;;  %v607_v24 = vpop.f32.mrf.mxu1 }
 0x146   : > { %v2009_v25 = vadd.f32 %v584_v21, %v555_v20  ;;  %v2011_v26 = vadd.f32 %v607_v24, %v555_v20  ;;  %v523_v21 = vld [vmem:[%s2385_s4] sm:$0xff] }
 0x148   : > { %v613_v27 = vadd.f32 %v2011_v26, %v2009_v25  ;;  %v618_v28 = vmul.f32 %v2009_v25, %v2009_v25  ;;  %v619_v31 = vmul.f32 %v2011_v26, %v2011_v26 }
 0x14a   : > { %614 = vadd.xlane.f32.xlu0 %v613_v27  ;;  %v623_v32 = vadd.f32 %v619_v31, %v618_v28 }
 0x14c   : > { %624 = vadd.xlane.f32.xlu2 %v623_v32 }
 0x154   : > { %621 = vadd.xlane.f32.xlu2 %v620_v35  ;;  %v525_v35 = vld [vmem:[%s2386_s5] sm:$0xff] }
 0x1b5   : > { %v612_v38 = vpop.xlane.xlu1 %611 }
 0x1bd   : > { %v615_v36 = vpop.xlane.xlu0 %614 }
 0x1be   : > { %647 = vmatpush.msra.mxu2 %v615_v36  ;;  %v524_v36 = vld [vmem:[%s2385_s4 + $0x8] sm:$0xff] }
 0x1bf   : > { %v625_v40 = vpop.xlane.xlu2 %624 }
 0x1c0   : > { %648 = vmatpush.msra.mxu2 %v612_v38  ;;  %670 = vmatpush.msra.mxu3 %v625_v40 }
 0x1c1   : > { %1493 = vmatmul.msk.f32.vlgmr.msra.gmra.mxu2 %vm2401_vm9, %v2026_v37 }
 0x1c7   : > { %v622_v45 = vpop.xlane.xlu2 %621 }
 0x1c8   : > { %671 = vmatpush.msra.mxu3 %v622_v45 }
 0x1c9   : > { %1495 = vmatmul.msk.f32.vlgmr.msra.gmra.mxu3 %vm2401_vm9, %v2026_v37  ;;  %1494 = vmatmul.msk.f32.gmra.mxu2 %vm2401_vm9, %v2033_v44 }
 0x1d1   : > { %1496 = vmatmul.msk.f32.gmra.mxu3 %vm2401_vm9, %v2033_v44 }
 0x244   : > { %v650_v52 = vpop.f32.mrf.mxu2 }
 0x245   : > { %v686_v54 = vmul.f32 %v2041_v53, %v650_v52 }
 0x247   : > { %v690_v57 = vmul.f32 %v686_v54, %v686_v54 }
 0x24c   : > { %v673_v58 = vpop.f32.mrf.mxu3  ;;  %v653_v59 = vpop.f32.mrf.mxu2 }
 0x24d   : > { %v688_v60 = vmul.f32 %v2041_v53, %v673_v58  ;;  %v687_v62 = vmul.f32 %v2041_v53, %v653_v59 }
 0x24f   : > { %v692_v61 = vsub.f32 %v688_v60, %v690_v57  ;;  %v691_v2 = vmul.f32 %v687_v62, %v687_v62 }
 0x251   : > { %v694_v63 = vadd.f32 1e-05, %v692_v61 }
 0x253   : > { %1588 = vrsqrt.f32 %v694_v63  ;;  %vm702_vm12 = vweird.f32 %v694_v63 }
 0x254   : > { %v676_v3 = vpop.f32.mrf.mxu3 }
 0x255   : > { %v689_v4 = vmul.f32 %v2041_v53, %v676_v3 }
 0x257   : > { %v693_v5 = vsub.f32 %v689_v4, %v691_v2 }
 0x259   : > { %v1589_v7 = vpop.eup %1588  ;;  %v695_v10 = vadd.f32 1e-05, %v693_v5 }
 0x25a   : > { %v697_v11 = vmul.f32 %v1589_v7, %v694_v63  ;;  %vm703_vm11 = vweird.f32 %v1589_v7 }
 0x25b   : > { %1590 = vrsqrt.f32 %v695_v10  ;;  %vm704_vm13 = vmor %vm702_vm12, %vm703_vm11  ;;  %vm712_vm14 = vweird.f32 %v695_v10 }
 0x25c   : > { %v698_v12 = vmul.f32 %v1589_v7, %v697_v11 }
 0x25e   : > { %v699_v13 = vmul.f32 0.5, %v698_v12 }
 0x260   : > { %v700_v14 = vsub.f32 1.5, %v699_v13 }
 0x261   : > { %v1591_v19 = vpop.eup %1590 }
 0x262   : > { %v707_v20 = vmul.f32 %v1591_v19, %v695_v10  ;;  %v701_v24 = vmul.f32 %v1589_v7, %v700_v14  ;;  %vm713_vm15 = vweird.f32 %v1591_v19 }
 0x263   : > { %vm714_vm8 = vmor %vm712_vm14, %vm713_vm15 }
 0x264   : > { %v708_v27 = vmul.f32 %v1591_v19, %v707_v20  ;;  %v705_v28 = vsel %vm704_vm13, %v1589_v7, %v701_v24 }
 0x265   : > { %v716_v31 = vmul.f32 %v705_v28, %v523_v21 }
 0x266   : > { %v709_v32 = vmul.f32 0.5, %v708_v27 }
 0x267   : > { %724 = vperm.xlu1 %1583, %v716_v31   ;;  %v718_v34 = vmul.f32 %v716_v31, %v686_v54 }
 0x268   : > { %v710_v33 = vsub.f32 1.5, %v709_v32 }
 0x269   : > { %v720_v45 = vsub.f32 %v525_v35, %v718_v34 }
 0x26a   : > { %v711_v38 = vmul.f32 %v1591_v19, %v710_v33 }
 0x26c   : > { %v715_v40 = vsel %vm714_vm8, %v1591_v19, %v711_v38 }
 0x26d   : > { %v717_v46 = vmul.f32 %v715_v40, %v524_v36 }
 0x26f   : > { %738 = vperm.xlu1 %1583, %v720_v45   ;;  %729 = vperm.xlu0 %1585, %v717_v46   ;;  %v719_v48 = vmul.f32 %v717_v46, %v687_v62 }
 0x271   : > { %v721_v49 = vsub.f32 %v526_v47, %v719_v48 }
 0x273   : > { %743 = vperm.xlu2 %1584, %v721_v49  }
 0x2cd   : > { %v744_v3 = vpop.permute.xlu2 %743 }
 0x2d9   : > { %v725_v50 = vpop.permute.xlu1 %724 }
 0x2da   : > { %v732_v51 = vmul.f32 %v725_v50, %v2003_v15  ;;  %v733_v52 = vmul.f32 %v725_v50, %v2005_v18 }
 0x2e1   : > { %v739_v54 = vpop.permute.xlu1 %738  ;;  %v730_v61 = vpop.permute.xlu0 %729 }
 0x2e2   : > { %v746_v57 = vadd.f32 %v739_v54, %v732_v51  ;;  %v747_v58 = vadd.f32 %v739_v54, %v733_v52  ;;  %v735_v63 = vmul.f32 %v730_v61, %v2011_v26  ;;  %v734_v15 = vmul.f32 %v730_v61, %v2009_v25 }
 0x2e4   : > { %v1497_v59 = vmul.f32 -1.442695, %v746_v57  ;;  %v1498_v60 = vmul.f32 -1.442695, %v747_v58  ;;  %v2062_v5 = vadd.f32 %v744_v3, %v735_v63  ;;  %v2066_v10 = vadd.f32 %v744_v3, %v734_v15 }
 0x2e6   : > { %1592 = vpow2.f32 %v1497_v59  ;;  %v1500_v18 = vmul.f32 -1.442695, %v2062_v5  ;;  %v1499_v19 = vmul.f32 -1.442695, %v2066_v10 }
 0x2e7   : > { %1594 = vpow2.f32 %v1498_v60 }
 0x2ec   : > { %v1593_v2 = vpop.eup %1592 }
 0x2ed   : > { %v1595_v62 = vpop.eup %1594  ;;  %v762_v4 = vadd.f32 1.0, %v1593_v2 }
 0x2ee   : > { %v763_v7 = vadd.f32 1.0, %v1595_v62 }
 0x2ef   : > { %1596 = vrcp.f32 %v762_v4  ;;  %v777_v20 = vand.u32 2147483648, %v762_v4  ;;  %v775_v27 = vand.u32 2147483647, %v762_v4  ;;  %vm771_vm12 = vweird.f32 %v762_v4 }
 0x2f0   : > { %1598 = vrcp.f32 %v763_v7  ;;  %v792_v28 = vand.u32 2147483648, %v763_v7  ;;  %v790_v32 = vand.u32 2147483647, %v763_v7  ;;  %vm786_vm14 = vweird.f32 %v763_v7 }
 0x2f1   : > { %1600 = vpow2.f32 %v1500_v18  ;;  %v778_v34 = vor.u32 1.1754944e-38, %v777_v20  ;;  %vm776_vm15 = vcmp.eq.f32.partialorder %v775_v27, 8.507059e+37 }
 0x2f2   : > { %1602 = vpow2.f32 %v1499_v19  ;;  %v793_v38 = vor.u32 1.1754944e-38, %v792_v28  ;;  %vm791_vm9 = vcmp.eq.f32.partialorder %v790_v32, 8.507059e+37 }
 0x2f5   : > { %v1597_v11 = vpop.eup %1596 }
 0x2f6   : > { %v1599_v12 = vpop.eup %1598  ;;  %v767_v13 = vmul.f32 %v1597_v11, %v762_v4  ;;  %vm772_vm10 = vweird.f32 %v1597_v11 }
 0x2f7   : > { %v782_v26 = vmul.f32 %v1599_v12, %v763_v7  ;;  %v1601_v31 = vpop.eup %1600  ;;  %vm787_vm11 = vweird.f32 %v1599_v12  ;;  %vm773_vm13 = vmor %vm771_vm12, %vm772_vm10 }
 0x2f8   : > { %v768_v14 = vsub.f32 1.0, %v767_v13  ;;  %vm788_vm8 = vmor %vm786_vm14, %vm787_vm11  ;;  %v765_v40 = vadd.f32 1.0, %v1601_v31  ;;  %v1603_v50 = vpop.eup %1602 }
 0x2f9   : > { %v783_v21 = vsub.f32 1.0, %v782_v26  ;;  %v764_v51 = vadd.f32 1.0, %v1603_v50  ;;  %v993_v50 = vld [vmem:[#allocation4 + $0xf8] sm:$0xff] }
 0x2fa   : > { %v769_v24 = vmul.f32 %v1597_v11, %v768_v14  ;;  %1604 = vrcp.f32 %v765_v40  ;;  %v822_v2 = vand.u32 2147483648, %v765_v40  ;;  %vm816_vm10 = vweird.f32 %v765_v40 }
 0x2fb   : > { %v784_v25 = vmul.f32 %v1599_v12, %v783_v21  ;;  %1606 = vrcp.f32 %v764_v51  ;;  %v820_v3 = vand.u32 2147483647, %v765_v40  ;;  %vm801_vm14 = vweird.f32 %v764_v51 }
 0x2fc   : > { %v770_v33 = vadd.f32 %v1597_v11, %v769_v24  ;;  %v823_v7 = vor.u32 1.1754944e-38, %v822_v2 }
 0x2fd   : > { %v785_v35 = vadd.f32 %v1599_v12, %v784_v25  ;;  %vm821_vm12 = vcmp.eq.f32.partialorder %v820_v3, 8.507059e+37 }
 0x2fe   : > { %v774_v36 = vsel %vm773_vm13, %v1597_v11, %v770_v33  ;;  %v807_v11 = vand.u32 2147483648, %v764_v51 }
 0x2ff   : > { %v779_v45 = vsel %vm776_vm15, %v778_v34, %v774_v36  ;;  %v789_v46 = vsel %vm788_vm8, %v1599_v12, %v785_v35  ;;  %v805_v12 = vand.u32 2147483647, %v764_v51 }
 0x300   : > { %v794_v47 = vsel %vm791_vm9, %v793_v38, %v789_v46  ;;  %v2069_v48 = vmul.f32 %v779_v45, %v746_v57  ;;  %v1605_v52 = vpop.eup %1604  ;;  %v808_v14 = vor.u32 1.1754944e-38, %v807_v11 }
 0x301   : > { %v2071_v49 = vmul.f32 %v794_v47, %v747_v58  ;;  %v812_v54 = vmul.f32 %v1605_v52, %v765_v40  ;;  %v1607_v57 = vpop.eup %1606  ;;  %vm817_vm9 = vweird.f32 %v1605_v52  ;;  %vm806_vm8 = vcmp.eq.f32.partialorder %v805_v12, 8.507059e+37  ;;  %v992_v47 = vld [vmem:[#allocation4 + $0xf0] sm:$0xff] }
 0x302   : > { %978 = vrot.lane.b32.xlu2 %v2069_v48, %s1729_s13  ;;  %v797_v59 = vmul.f32 %v1607_v57, %v764_v51  ;;  %vm818_vm11 = vmor %vm816_vm10, %vm817_vm9  ;;  %vm802_vm13 = vweird.f32 %v1607_v57 }
 0x303   : > { %958 = vrot.lane.b32.xlu1 %v2071_v49, %s1731_s14  ;;  %982 = vrot.lane.b32.xlu0 %v2071_v49, %s1729_s13  ;;  %v813_v58 = vsub.f32 1.0, %v812_v54  ;;  %vm803_vm15 = vmor %vm801_vm14, %vm802_vm13 }
 0x304   : > { %v798_v61 = vsub.f32 1.0, %v797_v59 }
 0x305   : > { %v814_v60 = vmul.f32 %v1605_v52, %v813_v58 }
 0x306   : > { %v799_v62 = vmul.f32 %v1607_v57, %v798_v61 }
 0x307   : > { %v815_v63 = vadd.f32 %v1605_v52, %v814_v60 }
 0x308   : > { %v800_v15 = vadd.f32 %v1607_v57, %v799_v62  ;;  %v968_v62 = vld [vmem:[#allocation4 + $0xd0] sm:$0xff] }
 0x309   : > { %v819_v4 = vsel %vm818_vm11, %v1605_v52, %v815_v63 }
 0x30a   : > { %934 = vrot.lane.b32.xlu2 %v2071_v49, %s1732_s15  ;;  %v824_v18 = vsel %vm821_vm12, %v823_v7, %v819_v4  ;;  %v804_v26 = vsel %vm803_vm15, %v1607_v57, %v800_v15  ;;  %v969_v4 = vld [vmem:[#allocation4 + $0xd8] sm:$0xff] }
 0x30b   : > { %930 = vrot.lane.b32.xlu1 %v2069_v48, %s1732_s15  ;;  %954 = vrot.lane.b32.xlu0 %v2069_v48, %s1731_s14  ;;  %v2098_v13 = vmul.f32 %v824_v18, %v2062_v5  ;;  %v809_v19 = vsel %vm806_vm8, %v808_v14, %v804_v26  ;;  %v1026_v5 = vld [vmem:[%s2388_s7] sm:$0xff] }
 0x30c   : > { %v2107_v20 = vmul.f32 %v809_v19, %v2066_v10  ;;  %v1027_v10 = vld [vmem:[%s2388_s7 + $0x8] sm:$0xff] }
 0x312   : > { %902 = vrot.lane.b32.xlu2 %v2069_v48, %s1733_s16 }
 0x313   : > { %882 = vrot.lane.b32.xlu1 %v2071_v49, %s2408_s22  ;;  %906 = vrot.lane.b32.xlu0 %v2071_v49, %s1733_s16 }
 0x31a   : > { %858 = vrot.lane.b32.xlu2 %v2071_v49, %s2409_s24 }
 0x31b   : > { %854 = vrot.lane.b32.xlu1 %v2069_v48, %s2409_s24  ;;  %878 = vrot.lane.b32.xlu0 %v2069_v48, %s2408_s22 }
 0x322   : > { %830 = vrot.lane.b32.xlu2 %v2069_v48, %s2410_s29 }
 0x323   : > { %834 = vrot.lane.b32.xlu0 %v2071_v49, %s2410_s29  ;;  %984 = vrot.lane.b32.xlu1 %v2098_v13, %s1729_s13 }
 0x32a   : > { %980 = vrot.lane.b32.xlu2 %v2107_v20, %s1729_s13  ;;  %s2411_s13 = smov 111  }
 0x32b   : > { %936 = vrot.lane.b32.xlu0 %v2098_v13, %s1732_s15  ;;  %956 = vrot.lane.b32.xlu1 %v2107_v20, %s1731_s14 }
 0x332   : > { %960 = vrot.lane.b32.xlu2 %v2098_v13, %s1731_s14 }
 0x333   : > { %904 = vrot.lane.b32.xlu0 %v2107_v20, %s1733_s16  ;;  %908 = vrot.lane.b32.xlu1 %v2098_v13, %s1733_s16  ;;  %s394_s16 = sand.u32 1, %s1716_s18  }
 0x334   : > { %s1486_s30 = sshll.u32 %s394_s16, 5 }
 0x335   : > { %s2338_s12 = scalar_lea.vmem [#allocation7], %s1486_s30 }
 0x336   : > { %s1403_s14 = sshll.u32 %s2338_s12, 4  ;;  %s1404_s14 = int_to_ptr.vmem [resolvable:$true] %s1403_s14 }
 0x33a   : > { %932 = vrot.lane.b32.xlu2 %v2107_v20, %s1732_s15  ;;  %s1391_s15 = scalar_lea.sflag [#allocation6], %s394_s16 }
 0x33b   : > { %860 = vrot.lane.b32.xlu0 %v2098_v13, %s2409_s24  ;;  %880 = vrot.lane.b32.xlu1 %v2107_v20, %s2408_s22 }
 0x342   : > { %884 = vrot.lane.b32.xlu2 %v2098_v13, %s2408_s22 }
 0x343   : > { %832 = vrot.lane.b32.xlu0 %v2107_v20, %s2410_s29  ;;  %836 = vrot.lane.b32.xlu1 %v2098_v13, %s2410_s29 }
 0x34a   : > { %856 = vrot.lane.b32.xlu2 %v2107_v20, %s2409_s24 }
 0x34b   : > { %1002 = vrot.lane.b32.xlu0 %v2069_v48, %s2411_s13  ;;  %1004 = vrot.lane.b32.xlu1 %v2107_v20, %s2411_s13 }
 0x352   : > { %1008 = vrot.lane.b32.xlu2 %v2098_v13, %s2411_s13 }
 0x353   : > { %1074 = vperm.xlu0 %1585, %v1026_v5   ;;  %1006 = vrot.lane.b32.xlu1 %v2071_v49, %s2411_s13  ;;  %v944_v5 = vld [vmem:[#allocation4 + $0xb0] sm:$0xff]  ;;  %s1402_s13 = scalar_lea.hbm %s2392_s11, %s1519_s25 }
 0x354   : > { %s1405_s21 = sshll.u32 %s1402_s13, 4  ;;  %s1678_s13 = scalar_lea.hbm %s2392_s11, 64  ;;  %s1406_s21 = int_to_ptr.hbm [resolvable:$true] %s1405_s21 }
 0x355   : > { %s1672_s30 = sshra.s32 %s1406_s21, 4  ;;  %s1673_s30 = int_to_ptr.hbm [resolvable:$true] %s1672_s30 }
 0x356   : > { %s1674_s25 = scalar_lea.hbm %s1673_s30, 32  ;;  %p1679_p3 = scmp.lt.s32.totalorder %s1673_s30, %s2392_s11 }
 0x357   : > { %p1675_p0 = scmp.ne.s32.totalorder %s1673_s30, %s1674_s25  ;;  %p1680_p4 = scmp.lt.s32.totalorder %s1678_s13, %s1674_s25 }
 0x359   : > { %p1676_p1 = pnand %p1675_p0, %p1838_p5  ;;  %p1681_p7 = por %p1680_p4, %p1679_p3 }
 0x35a   : > { %1079 = vperm.xlu2 %1584, %v1027_v10   ;;  %v945_v10 = vld [vmem:[#allocation4 + $0xb8] sm:$0xff] }
 0x35b   : > { %p1677_p2 = pneg %p1676_p1 }
 0x35c   : > { %v979_v21 = vpop.permute.xlu2 %978 }
 0x35d   : > { %p1682_p8 = pnand %p1681_p7, %p1677_p2 }
 0x364   : > { %v935_v24 = vpop.permute.xlu2 %934 }
 0x36c   : > { %v2149_v27 = vpop.permute.xlu2 %902 }
 0x374   : > { %v2151_v28 = vpop.permute.xlu2 %858 }
 0x375   : > { %v959_v31 = vpop.permute.xlu1 %958  ;;  %v983_v25 = vpop.permute.xlu0 %982 }
 0x376   : > { %v986_v54 = vsel %vm497_vm0, %v979_v21, %v983_v25  ;;  %v988_v57 = vsel %vm497_vm0, %v983_v25, %v979_v21 }
 0x377   : > { %v994_v63 = vmul.f32 %v986_v54, %v1916_v16  ;;  %v995_v2 = vmul.f32 %v988_v57, %v1918_v17  ;;  %v917_v57 = vld [vmem:[#allocation4 + $0x78] sm:$0xff] }
 0x37c   : > { %v2153_v32 = vpop.permute.xlu2 %830 }
 0x37d   : > { %v931_v33 = vpop.permute.xlu1 %930  ;;  %v955_v34 = vpop.permute.xlu0 %954 }
 0x37e   : > { %v962_v18 = vsel %vm483_vm2, %v955_v34, %v959_v31  ;;  %v964_v11 = vsel %vm483_vm2, %v959_v31, %v955_v34  ;;  %v938_v25 = vsel %vm469_vm3, %v931_v33, %v935_v24  ;;  %v940_v34 = vsel %vm469_vm3, %v935_v24, %v931_v33  ;;  %v916_v33 = vld [vmem:[#allocation4 + $0x70] sm:$0xff] }
 0x37f   : > { %v970_v21 = vmul.f32 %v962_v18, %v1926_v22  ;;  %v971_v31 = vmul.f32 %v964_v11, %v1928_v23  ;;  %v946_v54 = vmul.f32 %v938_v25, %v1935_v29  ;;  %v947_v22 = vmul.f32 %v940_v34, %v1937_v30  ;;  %v1017_v25 = vld [vmem:[#allocation4 + $0x118] sm:$0xff] }
 0x384   : > { %v981_v38 = vpop.permute.xlu2 %980 }
 0x385   : > { %v2155_v35 = vpop.permute.xlu1 %882  ;;  %v2157_v36 = vpop.permute.xlu0 %906 }
 0x386   : > { %v910_v29 = vsel %vm453_vm4, %v2149_v27, %v2157_v36  ;;  %v912_v30 = vsel %vm453_vm4, %v2157_v36, %v2149_v27 }
 0x38c   : > { %v961_v46 = vpop.permute.xlu2 %960 }
 0x38d   : > { %v2159_v40 = vpop.permute.xlu1 %854  ;;  %v2161_v45 = vpop.permute.xlu0 %878 }
 0x38e   : > { %v886_v27 = vsel %vm439_vm5, %v2161_v45, %v2155_v35  ;;  %v862_v18 = vsel %vm425_vm6, %v2159_v40, %v2151_v28  ;;  %v864_v11 = vsel %vm425_vm6, %v2151_v28, %v2159_v40 }
 0x394   : > { %v933_v3 = vpop.permute.xlu2 %932 }
 0x395   : > { %v2163_v51 = vpop.permute.xlu0 %834  ;;  %v985_v52 = vpop.permute.xlu1 %984 }
 0x396   : > { %v987_v58 = vsel %vm497_vm0, %v981_v38, %v985_v52  ;;  %v989_v59 = vsel %vm497_vm0, %v985_v52, %v981_v38  ;;  %v840_v28 = vsel %vm412_vm7, %v2163_v51, %v2153_v32  ;;  %vm2412_vm0 = vcmask 130048  }
 0x397   : > { %v996_v60 = vmul.f32 %v992_v47, %v987_v58  ;;  %v997_v61 = vmul.f32 %v993_v50, %v989_v59 }
 0x399   : > { %1088 = vmatpush.msrb.mxu2 %v996_v60  ;;  %1134 = vmatpush.msrb.mxu0 %v997_v61  ;;  %v892_v60 = vld [vmem:[#allocation4 + $0x50] sm:$0xff] }
 0x39b   : > { %1089 = vmatpush.msrb.mxu2 %v994_v63  ;;  %1135 = vmatpush.msrb.mxu0 %v995_v2  ;;  %v918_v63 = vmul.f32 %v912_v30, %v1954_v39  ;;  %v919_v2 = vmul.f32 %v910_v29, %v1957_v41  ;;  %v1035_v29 = vld [vmem:[%s2387_s6 + $0x18] sm:$0xff] }
 0x39c   : > { %v885_v47 = vpop.permute.xlu2 %884 }
 0x39d   : > { %v937_v7 = vpop.permute.xlu0 %936  ;;  %v957_v15 = vpop.permute.xlu1 %956 }
 0x39e   : > { %v963_v12 = vsel %vm483_vm2, %v957_v15, %v961_v46  ;;  %v965_v16 = vsel %vm483_vm2, %v961_v46, %v957_v15  ;;  %v939_v14 = vsel %vm469_vm3, %v933_v3, %v937_v7  ;;  %v941_v19 = vsel %vm469_vm3, %v937_v7, %v933_v3  ;;  %v868_v7 = vld [vmem:[#allocation4 + $0x30] sm:$0xff]  ;;  %v869_v15 = vld [vmem:[#allocation4 + $0x38] sm:$0xff]  ;;  %vm2413_vm2 = vmmov %vm2412_vm0 }
 0x39f   : > { %v972_v17 = vmul.f32 %v968_v62, %v963_v12  ;;  %v973_v26 = vmul.f32 %v969_v4, %v965_v16  ;;  %v948_v38 = vmul.f32 %v944_v5, %v939_v14  ;;  %v949_v46 = vmul.f32 %v945_v10, %v941_v19  ;;  %vm2414_vm3 = vmmov %vm2412_vm0 }
 0x3a0   : > { %v871_v19 = vmul.f32 %v862_v18, %v1978_v56  ;;  %v838_v5 = vsel %vm412_vm7, %v2153_v32, %v2163_v51  ;;  %v1032_v32 = vld [vmem:[%s2387_s6] sm:$0xff]  ;;  %v1016_v51 = vld [vmem:[#allocation4 + $0x110] sm:$0xff] }
 0x3a1   : > { %1090 = vmatpush.msrb.mxu2 %v972_v17  ;;  %1136 = vmatpush.msrb.mxu0 %v973_v26  ;;  %v844_v17 = vld [vmem:[#allocation4 + $0x10] sm:$0xff]  ;;  %v845_v26 = vld [vmem:[#allocation4 + $0x18] sm:$0xff] }
 0x3a3   : > { %1091 = vmatpush.msrb.mxu2 %v970_v21  ;;  %1137 = vmatpush.msrb.mxu0 %v971_v31  ;;  %v846_v21 = vmul.f32 %v840_v28, %v1987_v0  ;;  %v847_v31 = vmul.f32 %v838_v5, %v1989_v1 }
 0x3a4   : > { %v857_v3 = vpop.permute.xlu2 %856 }
 0x3a5   : > { %v905_v50 = vpop.permute.xlu0 %904  ;;  %v909_v52 = vpop.permute.xlu1 %908  ;;  %1092 = vmatpush.msrb.mxu2 %v948_v38  ;;  %1138 = vmatpush.msrb.mxu0 %v949_v46 }
 0x3a6   : > { %v911_v23 = vsel %vm453_vm4, %v905_v50, %v909_v52  ;;  %v913_v24 = vsel %vm453_vm4, %v909_v52, %v905_v50  ;;  %v1034_v50 = vld [vmem:[%s2387_s6 + $0x10] sm:$0xff]  ;;  %vm2416_vm4 = vmmov %vm2412_vm0 }
 0x3a7   : > { %1093 = vmatpush.msrb.mxu2 %v946_v54  ;;  %1139 = vmatpush.msrb.mxu0 %v947_v22  ;;  %v920_v58 = vmul.f32 %v916_v33, %v913_v24  ;;  %v921_v59 = vmul.f32 %v917_v57, %v911_v23  ;;  %v1033_v57 = vld [vmem:[%s2387_s6 + $0x8] sm:$0xff] }
 0x3a9   : > { %1094 = vmatpush.msrb.mxu2 %v2107_v20  ;;  %1140 = vmatpush.msrb.mxu0 %v2098_v13  ;;  %v893_v20 = vld [vmem:[#allocation4 + $0x58] sm:$0xff] }
 0x3ab   : > { %1095 = vmatpush.msrb.mxu2 %v2069_v48  ;;  %1141 = vmatpush.msrb.mxu0 %v2071_v49  ;;  %v888_v48 = vsel %vm439_vm5, %v2155_v35, %v2161_v45  ;;  %v895_v45 = vmul.f32 %v886_v27, %v1961_v43  ;;  %v870_v43 = vmul.f32 %v864_v11, %v1976_v55 }
 0x3ac   : > { %v894_v35 = vmul.f32 %v888_v48, %v1959_v42  ;;  %v1009_v34 = vpop.permute.xlu2 %1008 }
 0x3ad   : > { %v861_v61 = vpop.permute.xlu0 %860  ;;  %v881_v13 = vpop.permute.xlu1 %880  ;;  %1096 = vmatpush.msrb.mxu2 %v920_v58  ;;  %1142 = vmatpush.msrb.mxu0 %v921_v59 }
 0x3ae   : > { %v887_v49 = vsel %vm439_vm5, %v881_v13, %v885_v47  ;;  %v889_v36 = vsel %vm439_vm5, %v885_v47, %v881_v13  ;;  %v863_v62 = vsel %vm425_vm6, %v857_v3, %v861_v61  ;;  %v865_v4 = vsel %vm425_vm6, %v861_v61, %v857_v3  ;;  %vm2417_vm5 = vmmov %vm2412_vm0 }
 0x3af   : > { %1097 = vmatpush.msrb.mxu2 %v918_v63  ;;  %1143 = vmatpush.msrb.mxu0 %v919_v2  ;;  %v896_v39 = vmul.f32 %v892_v60, %v889_v36  ;;  %v897_v41 = vmul.f32 %v893_v20, %v887_v49  ;;  %v872_v12 = vmul.f32 %v868_v7, %v865_v4  ;;  %vm2418_vm6 = vmmov %vm2412_vm0 }
 0x3b0   : > { %v873_v16 = vmul.f32 %v869_v15, %v863_v62 }
 0x3b1   : > { %1098 = vmatpush.msrb.mxu2 %v896_v39  ;;  %1144 = vmatpush.msrb.mxu0 %v897_v41 }
 0x3b3   : > { %1099 = vmatpush.msrb.mxu2 %v894_v35  ;;  %1145 = vmatpush.msrb.mxu0 %v895_v45 }
 0x3b4   : > { %v1080_v63 = vpop.permute.xlu2 %1079 }
 0x3b5   : > { %v833_v14 = vpop.permute.xlu0 %832  ;;  %v837_v42 = vpop.permute.xlu1 %836  ;;  %1100 = vmatpush.msrb.mxu2 %v872_v12  ;;  %1146 = vmatpush.msrb.mxu0 %v873_v16 }
 0x3b6   : > { %v839_v40 = vsel %vm412_vm7, %v833_v14, %v837_v42  ;;  %v841_v10 = vsel %vm412_vm7, %v837_v42, %v833_v14  ;;  %vm2419_vm7 = vmmov %vm2412_vm0 }
 0x3b7   : > { %1101 = vmatpush.msrb.mxu2 %v870_v43  ;;  %1147 = vmatpush.msrb.mxu0 %v871_v19  ;;  %v848_v55 = vmul.f32 %v844_v17, %v841_v10  ;;  %v849_v56 = vmul.f32 %v845_v26, %v839_v40 }
 0x3b9   : > { %1102 = vmatpush.msrb.mxu2 %v848_v55  ;;  %1148 = vmatpush.msrb.mxu0 %v849_v56 }
 0x3bb   : > { %1103 = vmatpush.msrb.mxu2 %v846_v21  ;;  %1149 = vmatpush.msrb.mxu0 %v847_v31 }
 0x3bc   : > { %1104 = vmatmul.f32.vlgmr.msrb.gmra.mxu2 %v1032_v32  ;;  %1150 = vmatmul.f32.vlgmr.msrb.gmra.mxu0 %v1032_v32 }
 0x3bd   : > { %v1005_v38 = vpop.permute.xlu1 %1004  ;;  %v1003_v52 = vpop.permute.xlu0 %1002 }
 0x3be   : > { %v1011_v46 = vsel %vm511_vm1, %v1005_v38, %v1009_v34  ;;  %v1013_v0 = vsel %vm511_vm1, %v1009_v34, %v1005_v38 }
 0x3bf   : > { %v1020_v47 = vmul.f32 %v1016_v51, %v1011_v46  ;;  %v1021_v1 = vmul.f32 %v1017_v25, %v1013_v0  ;;  %v1028_v0 = vld [vmem:[%s2389_s8] sm:$0xff] }
 0x3c1   : > { %1125 = vmatpush.msrb.mxu3 %v1020_v47  ;;  %1171 = vmatpush.msrb.mxu1 %v1021_v1 }
 0x3c4   : > { %1107 = vmatmul.f32.gmra.mxu2 %v1034_v50  ;;  %1153 = vmatmul.f32.gmra.mxu0 %v1034_v50 }
 0x3c5   : > { %v1007_v54 = vpop.permute.xlu1 %1006  ;;  %v1075_v30 = vpop.permute.xlu0 %1074 }
 0x3c6   : > { %v1010_v22 = vsel %vm511_vm1, %v1003_v52, %v1007_v54  ;;  %v1012_v23 = vsel %vm511_vm1, %v1007_v54, %v1003_v52  ;;  %vm2415_vm1 = vmmov %vm2412_vm0  ;;  %v1030_v54 = vld [vmem:[%s2390_s9] sm:$0xff] }
 0x3c7   : > { %v1018_v24 = vmul.f32 %v1010_v22, %v1903_v8  ;;  %v1019_v33 = vmul.f32 %v1012_v23, %v1905_v9 }
 0x3c9   : > { %1126 = vmatpush.msrb.mxu3 %v1018_v24  ;;  %1172 = vmatpush.msrb.mxu1 %v1019_v33  ;;  %v1029_v33 = vld [vmem:[%s2389_s8 + $0x8] sm:$0xff] }
 0x3ca   : > { %1501 = vmatmul.msk.f32.vlgmr.msrb.gmra.mxu3 %vm2412_vm0, %v1033_v57  ;;  %1503 = vmatmul.msk.f32.vlgmr.msrb.gmra.mxu1 %vm2413_vm2, %v1033_v57 }
 0x3d2   : > { %1502 = vmatmul.msk.f32.gmra.mxu3 %vm2414_vm3, %v1035_v29  ;;  %1504 = vmatmul.msk.f32.gmra.mxu1 %vm2415_vm1, %v1035_v29 }
 0x439   : > { %v1151_v6 = vpop.f32.mrf.mxu0 }
 0x43a   : > { %v1152_v58 = vadd.f32 %v1151_v6, %v1075_v30 }
 0x43f   : > { %v1105_v8 = vpop.f32.mrf.mxu2 }
 0x440   : > { %v1106_v59 = vadd.f32 %v1105_v8, %v1075_v30 }
 0x441   : > { %v1154_v13 = vpop.f32.mrf.mxu0 }
 0x442   : > { %v1155_v49 = vadd.f32 %v1154_v13, %v1080_v63 }
 0x447   : > { %v1174_v9 = vpop.f32.mrf.mxu1  ;;  %v1108_v27 = vpop.f32.mrf.mxu2 }
 0x448   : > { %v2281_v20 = vadd.f32 %v1174_v9, %v1152_v58  ;;  %v1109_v36 = vadd.f32 %v1108_v27, %v1080_v63  ;;  %v1031_v9 = vld [vmem:[%s2390_s9 + $0x8] sm:$0xff] }
 0x44a   : > { %v1187_v45 = vmul.f32 %v2281_v20, %v2281_v20 }
 0x44d   : > { %v1128_v60 = vpop.f32.mrf.mxu3 }
 0x44e   : > { %v2283_v61 = vadd.f32 %v1128_v60, %v1106_v59 }
 0x44f   : > { %v1177_v48 = vpop.f32.mrf.mxu1 }
 0x450   : > { %v1180_v2 = vadd.f32 %v2281_v20, %v2283_v61  ;;  %v2287_v3 = vadd.f32 %v1177_v48, %v1155_v49  ;;  %v1186_v35 = vmul.f32 %v2283_v61, %v2283_v61 }
 0x452   : > { %1181 = vadd.xlane.f32.xlu2 %v1180_v2  ;;  %v1189_v7 = vmul.f32 %v2287_v3, %v2287_v3  ;;  %v1190_v18 = vadd.f32 %v1187_v45, %v1186_v35 }
 0x455   : > { %v1131_v39 = vpop.f32.mrf.mxu3 }
 0x456   : > { %v2289_v41 = vadd.f32 %v1131_v39, %v1109_v36 }
 0x458   : > { %v1183_v62 = vadd.f32 %v2287_v3, %v2289_v41  ;;  %v1188_v4 = vmul.f32 %v2289_v41, %v2289_v41 }
 0x45a   : > { %1184 = vadd.xlane.f32.xlu1 %v1183_v62  ;;  %v1193_v15 = vadd.f32 %v1189_v7, %v1188_v4 }
 0x45c   : > { %1194 = vadd.xlane.f32.xlu0 %v1193_v15 }
 0x462   : > { %1191 = vadd.xlane.f32.xlu1 %v1190_v18 }
 0x4c5   : > { %v1182_v12 = vpop.xlane.xlu2 %1181 }
 0x4cd   : > { %v1185_v11 = vpop.xlane.xlu1 %1184 }
 0x4ce   : > { %1210 = vmatpush.msra.mxu3 %v1185_v11 }
 0x4cf   : > { %v1195_v16 = vpop.xlane.xlu0 %1194 }
 0x4d0   : > { %1211 = vmatpush.msra.mxu3 %v1182_v12  ;;  %1233 = vmatpush.msra.mxu1 %v1195_v16 }
 0x4d1   : > { %1505 = vmatmul.msk.f32.vlgmr.msra.gmra.mxu3 %vm2416_vm4, %v2026_v37 }
 0x4d5   : > { %v1192_v17 = vpop.xlane.xlu1 %1191 }
 0x4d6   : > { %1234 = vmatpush.msra.mxu1 %v1192_v17 }
 0x4d7   : > { %1507 = vmatmul.msk.f32.vlgmr.msra.gmra.mxu1 %vm2417_vm5, %v2026_v37 }
 0x4d9   : > { %1506 = vmatmul.msk.f32.gmra.mxu3 %vm2418_vm6, %v2033_v44 }
 0x4df   : > { %1508 = vmatmul.msk.f32.gmra.mxu1 %vm2419_vm7, %v2033_v44 }
 0x554   : > { %v1213_v26 = vpop.f32.mrf.mxu3  ;;  %v1236_v14 = vpop.f32.mrf.mxu1 }
 0x555   : > { %v1242_v42 = vmul.f32 %v1213_v26, %v2041_v53  ;;  %v1244_v43 = vmul.f32 %v1236_v14, %v2041_v53 }
 0x557   : > { %v1246_v19 = vmul.f32 %v1242_v42, %v1242_v42 }
 0x559   : > { %v1248_v5 = vsub.f32 %v1244_v43, %v1246_v19 }
 0x55b   : > { %v1250_v28 = vadd.f32 1e-05, %v1248_v5 }
 0x55c   : > { %v1216_v40 = vpop.f32.mrf.mxu3  ;;  %v1239_v10 = vpop.f32.mrf.mxu1 }
 0x55d   : > { %1608 = vrsqrt.f32 %v1250_v28  ;;  %v1243_v37 = vmul.f32 %v1216_v40, %v2041_v53  ;;  %v1245_v55 = vmul.f32 %v1239_v10, %v2041_v53  ;;  %vm1258_vm10 = vweird.f32 %v1250_v28 }
 0x55f   : > { %v1247_v56 = vmul.f32 %v1243_v37, %v1243_v37 }
 0x561   : > { %v1249_v21 = vsub.f32 %v1245_v55, %v1247_v56 }
 0x563   : > { %v1609_v31 = vpop.eup %1608  ;;  %v1251_v44 = vadd.f32 1e-05, %v1249_v21 }
 0x564   : > { %v1253_v32 = vmul.f32 %v1609_v31, %v1250_v28  ;;  %vm1259_vm9 = vweird.f32 %v1609_v31 }
 0x565   : > { %1610 = vrsqrt.f32 %v1251_v44  ;;  %vm1260_vm11 = vmor %vm1258_vm10, %vm1259_vm9  ;;  %vm1268_vm13 = vweird.f32 %v1251_v44 }
 0x566   : > { %v1254_v51 = vmul.f32 %v1609_v31, %v1253_v32 }
 0x568   : > { %v1255_v25 = vmul.f32 0.5, %v1254_v51 }
 0x56a   : > { %v1256_v34 = vsub.f32 1.5, %v1255_v25 }
 0x56b   : > { %v1611_v38 = vpop.eup %1610 }
 0x56c   : > { %v1263_v46 = vmul.f32 %v1611_v38, %v1251_v44  ;;  %v1257_v47 = vmul.f32 %v1609_v31, %v1256_v34  ;;  %vm1269_vm12 = vweird.f32 %v1611_v38 }
 0x56d   : > { %vm1270_vm14 = vmor %vm1268_vm13, %vm1269_vm12 }
 0x56e   : > { %v1264_v53 = vmul.f32 %v1611_v38, %v1263_v46  ;;  %v1261_v1 = vsel %vm1260_vm11, %v1609_v31, %v1257_v47 }
 0x56f   : > { %v1272_v50 = vmul.f32 %v1261_v1, %v1028_v0 }
 0x570   : > { %v1265_v52 = vmul.f32 0.5, %v1264_v53 }
 0x571   : > { %1280 = vperm.xlu2 %1584, %v1272_v50   ;;  %v1274_v22 = vmul.f32 %v1272_v50, %v1242_v42 }
 0x572   : > { %v1266_v23 = vsub.f32 1.5, %v1265_v52 }
 0x573   : > { %v1276_v24 = vsub.f32 %v1030_v54, %v1274_v22 }
 0x574   : > { %v1267_v57 = vmul.f32 %v1611_v38, %v1266_v23 }
 0x575   : > { %1294 = vperm.xlu1 %1583, %v1276_v24  }
 0x576   : > { %v1271_v29 = vsel %vm1270_vm14, %v1611_v38, %v1267_v57 }
 0x577   : > { %v1273_v6 = vmul.f32 %v1271_v29, %v1029_v33 }
 0x579   : > { %1285 = vperm.xlu0 %1585, %v1273_v6   ;;  %v1275_v8 = vmul.f32 %v1273_v6, %v1243_v37 }
 0x57b   : > { %v1277_v30 = vsub.f32 %v1031_v9, %v1275_v8 }
 0x581   : > { %1299 = vperm.xlu0 %1585, %v1277_v30  }
 0x5cb   : > { %v1281_v58 = vpop.permute.xlu2 %1280 }
 0x5cc   : > { %v1288_v59 = vmul.f32 %v1281_v58, %v2283_v61  ;;  %v1289_v60 = vmul.f32 %v1281_v58, %v2281_v20 }
 0x5e7   : > { %v1295_v13 = vpop.permute.xlu1 %1294 }
 0x5e8   : > { %v1302_v63 = vadd.f32 %v1295_v13, %v1288_v59  ;;  %v1303_v2 = vadd.f32 %v1295_v13, %v1289_v60 }
 0x5ea   : > { %v1509_v27 = vmul.f32 -1.442695, %v1302_v63  ;;  %v1510_v48 = vmul.f32 -1.442695, %v1303_v2 }
 0x5eb   : > { %v1286_v49 = vpop.permute.xlu0 %1285 }
 0x5ec   : > { %1612 = vpow2.f32 %v1509_v27  ;;  %v1290_v39 = vmul.f32 %v1286_v49, %v2289_v41  ;;  %v1291_v62 = vmul.f32 %v1286_v49, %v2287_v3 }
 0x5ed   : > { %1614 = vpow2.f32 %v1510_v48 }
 0x5f2   : > { %v1613_v36 = vpop.eup %1612 }
 0x5f3   : > { %v1615_v4 = vpop.eup %1614  ;;  %v1318_v7 = vadd.f32 1.0, %v1613_v36  ;;  %v1300_v15 = vpop.permute.xlu0 %1299 }
 0x5f4   : > { %v1319_v61 = vadd.f32 1.0, %v1615_v4  ;;  %v2329_v35 = vadd.f32 %v1300_v15, %v1290_v39  ;;  %v2331_v20 = vadd.f32 %v1300_v15, %v1291_v62 }
 0x5f5   : > { %1616 = vrcp.f32 %v1318_v7  ;;  %v1331_v26 = vand.u32 2147483647, %v1318_v7  ;;  %v1333_v14 = vand.u32 2147483648, %v1318_v7  ;;  %vm1327_vm0 = vweird.f32 %v1318_v7 }
 0x5f6   : > { %1618 = vrcp.f32 %v1319_v61  ;;  %v1511_v45 = vmul.f32 -1.442695, %v2329_v35  ;;  %v1512_v18 = vmul.f32 -1.442695, %v2331_v20  ;;  %v1348_v5 = vand.u32 2147483648, %v1319_v61 }
 0x5f7   : > { %v1346_v10 = vand.u32 2147483647, %v1319_v61  ;;  %v1334_v56 = vor.u32 1.1754944e-38, %v1333_v14  ;;  %vm1342_vm3 = vweird.f32 %v1319_v61  ;;  %vm1332_vm1 = vcmp.eq.f32.partialorder %v1331_v26, 8.507059e+37 }
 0x5f8   : > { %1620 = vpow2.f32 %v1511_v45  ;;  %v1349_v44 = vor.u32 1.1754944e-38, %v1348_v5 }
 0x5f9   : > { %1622 = vpow2.f32 %v1512_v18  ;;  %vm1347_vm5 = vcmp.eq.f32.partialorder %v1346_v10, 8.507059e+37 }
 0x5fb   : > { %v1617_v41 = vpop.eup %1616 }
 0x5fc   : > { %v1619_v11 = vpop.eup %1618  ;;  %v1323_v3 = vmul.f32 %v1617_v41, %v1318_v7  ;;  %vm1328_vm15 = vweird.f32 %v1617_v41 }
 0x5fd   : > { %v1338_v12 = vmul.f32 %v1619_v11, %v1319_v61  ;;  %vm1343_vm8 = vweird.f32 %v1619_v11  ;;  %vm1329_vm2 = vmor %vm1327_vm0, %vm1328_vm15 }
 0x5fe   : > { %v1324_v16 = vsub.f32 1.0, %v1323_v3  ;;  %v1621_v17 = vpop.eup %1620  ;;  %vm1344_vm4 = vmor %vm1342_vm3, %vm1343_vm8 }
 0x5ff   : > { %v1339_v42 = vsub.f32 1.0, %v1338_v12  ;;  %v1623_v43 = vpop.eup %1622  ;;  %v1320_v28 = vadd.f32 1.0, %v1621_v17 }
 0x600   : > { %v1325_v19 = vmul.f32 %v1617_v41, %v1324_v16  ;;  %v1321_v37 = vadd.f32 1.0, %v1623_v43 }
 0x601   : > { %v1340_v40 = vmul.f32 %v1619_v11, %v1339_v42  ;;  %1624 = vrcp.f32 %v1320_v28  ;;  %v1363_v50 = vand.u32 2147483648, %v1320_v28  ;;  %v1361_v22 = vand.u32 2147483647, %v1320_v28 }
 0x602   : > { %v1326_v55 = vadd.f32 %v1617_v41, %v1325_v19  ;;  %1626 = vrcp.f32 %v1321_v37  ;;  %v1378_v23 = vand.u32 2147483648, %v1321_v37  ;;  %v1376_v33 = vand.u32 2147483647, %v1321_v37 }
 0x603   : > { %v1341_v21 = vadd.f32 %v1619_v11, %v1340_v40  ;;  %vm1357_vm9 = vweird.f32 %v1320_v28  ;;  %v1364_v29 = vor.u32 1.1754944e-38, %v1363_v50  ;;  %vm1372_vm11 = vweird.f32 %v1321_v37 }
 0x604   : > { %v1330_v31 = vsel %vm1329_vm2, %v1617_v41, %v1326_v55  ;;  %vm1362_vm12 = vcmp.eq.f32.partialorder %v1361_v22, 8.507059e+37  ;;  %v1379_v9 = vor.u32 1.1754944e-38, %v1378_v23  ;;  %vm1377_vm14 = vcmp.eq.f32.partialorder %v1376_v33, 8.507059e+37 }
 0x605   : > { %v1335_v32 = vsel %vm1332_vm1, %v1334_v56, %v1330_v31  ;;  %v1345_v51 = vsel %vm1344_vm4, %v1619_v11, %v1341_v21 }
 0x606   : > { %v1350_v25 = vsel %vm1347_vm5, %v1349_v44, %v1345_v51  ;;  %v1382_v34 = vmul.f32 %v1335_v32, %v1302_v63 }
 0x607   : > { %v1383_v38 = vmul.f32 %v1350_v25, %v1303_v2  ;;  %v1625_v46 = vpop.eup %1624 }
 0x608   : > { %1386 = vst [vmem:[%s2338_s12] sm:$0xff] %v1382_v34  ;;  %v1627_v0 = vpop.eup %1626  ;;  %v1353_v47 = vmul.f32 %v1625_v46, %v1320_v28  ;;  %vm1358_vm6 = vweird.f32 %v1625_v46 }
 0x609   : > { %1387 = vst [vmem:[%s2338_s12 + $0x8] sm:$0xff] %v1383_v38  ;;  %v1368_v53 = vmul.f32 %v1627_v0, %v1321_v37  ;;  %vm1373_vm7 = vweird.f32 %v1627_v0  ;;  %vm1359_vm10 = vmor %vm1357_vm9, %vm1358_vm6 }
 0x60a   : > { %v1354_v1 = vsub.f32 1.0, %v1353_v47  ;;  %vm1374_vm13 = vmor %vm1372_vm11, %vm1373_vm7 }
 0x60b   : > { %v1369_v52 = vsub.f32 1.0, %v1368_v53 }
 0x60c   : > { %v1355_v54 = vmul.f32 %v1625_v46, %v1354_v1 }
 0x60d   : > { %v1370_v24 = vmul.f32 %v1627_v0, %v1369_v52 }
 0x60e   : > { %v1356_v57 = vadd.f32 %v1625_v46, %v1355_v54 }
 0x60f   : > { %v1371_v6 = vadd.f32 %v1627_v0, %v1370_v24 }
 0x610   : > { %v1360_v8 = vsel %vm1359_vm10, %v1625_v46, %v1356_v57 }
 0x611   : > { %v1365_v30 = vsel %vm1362_vm12, %v1364_v29, %v1360_v8  ;;  %v1375_v58 = vsel %vm1374_vm13, %v1627_v0, %v1371_v6 }
 0x612   : > { %v1380_v59 = vsel %vm1377_vm14, %v1379_v9, %v1375_v58  ;;  %v1384_v60 = vmul.f32 %v1365_v30, %v2329_v35 }
 0x613   : > { %v1385_v13 = vmul.f32 %v1380_v59, %v2331_v20 }
 0x614   : > { %1388 = vst [vmem:[%s2338_s12 + $0x10] sm:$0xff] %v1384_v60 }
 0x615   : > { %1389 = vst [vmem:[%s2338_s12 + $0x18] sm:$0xff] %v1385_v13 }
 0x616   : > { %1685 = shalt.err (!%p1682_p8)
}
 0x617   : > { %s1739_s16 = smov 256  }
 0x618   : > { %1524 = dma.vmem_to_hbm [thread:$0]  (%p1838_p5), %s1404_s14, 512, %s1406_s21, %s1391_s15, %s1739_s16, %s1739_s16, %s2409_s24  }
 0x619 PF: > { %p1536_p9 = scmp.ge.s32.totalorder %s1724_s20, 2  ;;  %s1420_s12 = sand.u32 1, %s1712_s17  }
 0x61a   : > { %s1421_s0 = scalar_lea.sflag [#allocation6], %s1420_s12 }
 0x61b   : > { %p1531_p10 = pnand %p1536_p9, %p1842_p6 }
 0x61d   : > { %p1532_p11 = pneg %p1531_p10 }
 0x61f   : > { %1707 = dma.done.wait (%p1532_p11), %s1421_s0, 512  }
 0x620   : > { %1709 = vsyncadd (%p1532_p11), %s1421_s0, 4294966784  ;;  %p22_p12 = scmp.ge.s32.totalorder %s1825_s23, 4   ;;  %s2420_s17 = smov %s1716_s18 }
 0x621   : > { %s2421_s18 = smov %s1720_s19  ;;  %s2422_s19 = smov %s1836_s26 }
 0x622   : > { %s2423_s20 = smov %s1825_s23  ;;  %24 = sbr.rel (!%p22_p12) target bundleno = 7 (0x7), region = 111 }
 0x627   :  { %1427 = vsyncpa [#allocation5], 1 }
 0x628   :  { %1429 = vsyncpa [#allocation5 + $0x1], 1 }
 0x629   :  { %1430 = vsyncpa [#allocation6], 1 }
 0x62a   :  { %1432 = vsyncpa [#allocation6 + $0x1], 1 }

</bundles_post_ra>
